<compile_context>
chip_gen: v7x
topology: tpu7x:2x2x1
jax: 0.10.0
libtpu: 0.0.40
codegen_flags: <defaults>
</compile_context>

<pallas_src>
import math
import numpy as np
import jax
import jax.numpy as jnp
from jax.experimental import pallas as pl
from jax.experimental.pallas import tpu as pltpu  # noqa: F401  (no TPU-specific params needed)

NHEAD = 2
LN_EPS = 1e-5
BN_EPS = 1e-5


# ---------------------------------------------------------------------------
# Weight-slab layout (shared by init packing and kernel carving).
# Every parameter lives in rows [row, row+nrows), lanes [0, ncols) of a (R, 128) slab.
# ---------------------------------------------------------------------------
def build_layout(t_in, L):
    matrices = [
        ("w0", (t_in, 4 * L)),          # [pool_mat | pool_mat @ Win0^T]  (layer-0 fused)
        ("win1", (L, 3 * L)),           # layer-1 in_proj^T
        ("wout0", (L, L)), ("wout1", (L, L)),
        ("w1_0", (L, 2 * L)), ("w1_1", (L, 2 * L)),
        ("w2_0", (2 * L, L)), ("w2_1", (2 * L, L)),
        ("wp1a", (L, 128)), ("wp1b", (L, 128)),      # projector Linear1 (BN folded), split
        ("wp2a", (128, 128)), ("wp2b", (128, 128)),  # projector Linear2, split along K
    ]
    vectors = [
        ("b0", 4 * L), ("bin1", 3 * L),
        ("bout0", L), ("bout1", L),
        ("b1_0", 2 * L), ("b1_1", 2 * L),
        ("b2_0", L), ("b2_1", L),
        ("g1_0", L), ("be1_0", L), ("g2_0", L), ("be2_0", L),
        ("g1_1", L), ("be1_1", L), ("g2_1", L), ("be2_1", L),
        ("bp1a", 128), ("bp1b", 128), ("bp2", 128),
    ]
    layout = {}
    row = 0
    for name, (r, c) in matrices:
        row = -(-row // 8) * 8          # 8-sublane align matrix starts
        layout[name] = (row, r, c)
        row += r
    for name, c in vectors:             # one row per bias/affine vector
        layout[name] = (row, 1, c)
        row += 1
    total_rows = -(-row // 8) * 8
    return layout, total_rows


def adaptive_avgpool_matrix(t_in, l_out):
    """Column-stochastic matrix implementing nn.AdaptiveAvgPool1d(l_out)."""
    P = np.zeros((t_in, l_out), np.float32)
    for i in range(l_out):
        s = (i * t_in) // l_out
        e = -((-(i + 1) * t_in) // l_out)  # ceil
        P[s:e, i] = 1.0 / (e - s)
    return jnp.asarray(P)


def init_branch_slab(key, t_in, L, pool_mat, layout, total_rows):
    """Deterministic synthetic weights packed into one (total_rows, 128) f32 slab.

    Static folds: attention 1/sqrt(hd) into Q columns of in_proj, pool matrix into the
    layer-0 in_proj, eval-mode BatchNorm into the projector's first Linear.
    """
    ks = jax.random.split(key, 14)

    def nrm(k, shape, scale=0.05):
        return jax.random.normal(k, shape, dtype=jnp.float32) * scale

    hd = L // NHEAD
    attn_scale = 1.0 / math.sqrt(hd)

    win_t = nrm(ks[0], (2, L, 3 * L))       # in_proj_weight^T, 2 encoder layers
    bin_ = nrm(ks[1], (2, 1, 3 * L))        # in_proj_bias
    win_t = win_t.at[:, :, :L].multiply(attn_scale)   # fold attention scale into Q
    bin_ = bin_.at[:, :, :L].multiply(attn_scale)

    wout_t = nrm(ks[2], (2, L, L))          # out_proj.weight^T
    bout = nrm(ks[3], (2, 1, L))
    w1_t = nrm(ks[4], (2, L, 2 * L))        # linear1.weight^T
    b1 = nrm(ks[5], (2, 1, 2 * L))
    w2_t = nrm(ks[6], (2, 2 * L, L))        # linear2.weight^T
    b2 = nrm(ks[7], (2, 1, L))

    wp1_t = nrm(ks[8], (L, 256))
    bp1 = nrm(ks[9], (1, 256))
    wp2_t = nrm(ks[10], (256, 128))
    bp2 = nrm(ks[11], (1, 128))

    # BatchNorm1d(256), eval mode: fold running stats + affine into Linear(L, 256).
    bn_w = 1.0 + nrm(ks[12], (1, 256))
    bn_b = nrm(ks[13], (1, 256))
    bn_rm = jnp.zeros((1, 256), jnp.float32)
    bn_rv = jnp.ones((1, 256), jnp.float32)
    bns = bn_w / jnp.sqrt(bn_rv + BN_EPS)
    bnh = bn_b - bn_rm * bns
    wp1f = wp1_t * bns
    bp1f = bp1 * bns + bnh

    # Fuse AdaptiveAvgPool1d + layer-0 in_proj into one matmul weight.
    w0 = jnp.concatenate([pool_mat, jnp.dot(pool_mat, win_t[0])], axis=1)      # (t_in, 4L)
    b0 = jnp.concatenate([jnp.zeros((1, L), jnp.float32), bin_[0]], axis=1)    # (1, 4L)

    ones = jnp.ones((1, L), jnp.float32)
    zeros = jnp.zeros((1, L), jnp.float32)
    tensors = {
        "w0": w0, "b0": b0,
        "win1": win_t[1], "bin1": bin_[1],
        "wout0": wout_t[0], "bout0": bout[0],
        "wout1": wout_t[1], "bout1": bout[1],
        "w1_0": w1_t[0], "b1_0": b1[0],
        "w1_1": w1_t[1], "b1_1": b1[1],
        "w2_0": w2_t[0], "b2_0": b2[0],
        "w2_1": w2_t[1], "b2_1": b2[1],
        "g1_0": ones, "be1_0": zeros, "g2_0": ones, "be2_0": zeros,
        "g1_1": ones, "be1_1": zeros, "g2_1": ones, "be2_1": zeros,
        "wp1a": wp1f[:, :128], "wp1b": wp1f[:, 128:],
        "bp1a": bp1f[:, :128], "bp1b": bp1f[:, 128:],
        "wp2a": wp2_t[:128, :], "wp2b": wp2_t[128:, :],
        "bp2": bp2,
    }
    slab = np.zeros((total_rows, 128), np.float32)
    for name, arr in tensors.items():
        r0, nr, nc = layout[name]
        slab[r0:r0 + nr, :nc] = np.asarray(arr, np.float32).reshape(nr, nc)
    return jnp.asarray(slab)


# ---------------------------------------------------------------------------
# Kernel
# ---------------------------------------------------------------------------
def make_tfc_kernel(layout, L):
    E = L
    hd = E // NHEAD

    def rd(w_ref, br, name):
        r0, nr, nc = layout[name]
        return w_ref[br, r0:r0 + nr, 0:nc]            # static slice: direct VMEM load

    def kernel(x_ref, w_ref, h_ref, z_ref):
        S = x_ref.shape[1]                            # sequence length = batch B (see header)

        # Head block masks, built ONCE and reused across both layers and both branches.
        sub = jax.lax.broadcasted_iota(jnp.int32, (2 * S, E), 0)
        lane = jax.lax.broadcasted_iota(jnp.int32, (2 * S, E), 1)
        hm_stack = ((sub < S) == (lane < hd)).astype(jnp.float32)   # (2S, E) head-block mask
        g0 = jax.lax.broadcasted_iota(jnp.int32, (S, 2 * S), 1) < S  # head-0 score lanes

        def layer_norm(x, g, b):
            m = jnp.mean(x, axis=-1, keepdims=True)
            v = jnp.mean((x - m) ** 2, axis=-1, keepdims=True)      # biased var (PyTorch LN)
            return (x - m) * jax.lax.rsqrt(v + LN_EPS) * g + b

        def attn(qkv, wout_t, bout):
            # nn.MultiheadAttention(E, nhead=2), N=1 folded; 1/sqrt(hd) pre-folded into Q.
            q = qkv[:, 0:E]
            k = qkv[:, E:2 * E]
            v = qkv[:, 2 * E:3 * E]
            # Stack both heads along sublanes with block masking: one matmul computes both
            # heads' scores, one matmul computes both heads' P@V (outputs land in the right
            # lane halves automatically).
            k2 = jnp.concatenate([k, k], axis=0) * hm_stack          # (2S, E)
            v2 = jnp.concatenate([v, v], axis=0) * hm_stack          # (2S, E)
            s = jax.lax.dot_general(q, k2, (((1,), (1,)), ((), ())),
                                    preferred_element_type=jnp.float32)   # (S, 2S)
            neg = jnp.float32(-1e30)
            m0 = jnp.max(jnp.where(g0, s, neg), axis=-1, keepdims=True)
            m1 = jnp.max(jnp.where(g0, neg, s), axis=-1, keepdims=True)
            p = jnp.exp(s - jnp.where(g0, m0, m1))
            d0 = jnp.sum(jnp.where(g0, p, 0.0), axis=-1, keepdims=True)
            d1 = jnp.sum(jnp.where(g0, 0.0, p), axis=-1, keepdims=True)
            # approx reciprocal: ~1e-3 relative error vs exact softmax (documented tolerance).
            p = p * pl.reciprocal(jnp.where(g0, d0, d1), approx=True)
            o = jnp.dot(p, v2, preferred_element_type=jnp.float32)   # (S, E), heads in place
            return jnp.dot(o, wout_t, preferred_element_type=jnp.float32) + bout

        def enc_layer(x, qkv, wout_t, bout, w1_t, b1, w2_t, b2, g1, be1, g2, be2):
            # Post-norm TransformerEncoderLayer (ReLU FFN, dropout = identity).
            x = layer_norm(x + attn(qkv, wout_t, bout), g1, be1)
            ff = jnp.maximum(jnp.dot(x, w1_t, preferred_element_type=jnp.float32) + b1, 0.0)
            ff = jnp.dot(ff, w2_t, preferred_element_type=jnp.float32) + b2
            return layer_norm(x + ff, g2, be2)

        # Two independent branches (time / freq), fully unrolled: their instruction streams
        # interleave so one branch's work hides the other's MXU/EUP latency.
        for br in range(2):
            x_raw = x_ref[br]                                        # (B, T_in)
            # Fused pool + layer-0 QKV: one matmul yields both.
            r = jnp.dot(x_raw, rd(w_ref, br, "w0"),
                        preferred_element_type=jnp.float32) + rd(w_ref, br, "b0")
            x = r[:, 0:L]                                            # pooled residual input
            qkv0 = r[:, L:4 * L]                                     # layer-0 QKV

            x = enc_layer(x, qkv0,
                          rd(w_ref, br, "wout0"), rd(w_ref, br, "bout0"),
                          rd(w_ref, br, "w1_0"), rd(w_ref, br, "b1_0"),
                          rd(w_ref, br, "w2_0"), rd(w_ref, br, "b2_0"),
                          rd(w_ref, br, "g1_0"), rd(w_ref, br, "be1_0"),
                          rd(w_ref, br, "g2_0"), rd(w_ref, br, "be2_0"))

            qkv1 = jnp.dot(x, rd(w_ref, br, "win1"),
                           preferred_element_type=jnp.float32) + rd(w_ref, br, "bin1")
            x = enc_layer(x, qkv1,
                          rd(w_ref, br, "wout1"), rd(w_ref, br, "bout1"),
                          rd(w_ref, br, "w1_1"), rd(w_ref, br, "b1_1"),
                          rd(w_ref, br, "w2_1"), rd(w_ref, br, "b2_1"),
                          rd(w_ref, br, "g1_1"), rd(w_ref, br, "be1_1"),
                          rd(w_ref, br, "g2_1"), rd(w_ref, br, "be2_1"))

            # h = encoder_out.reshape(B, -1) (C == 1). Lane-dense store: full 128-lane rows
            # (zeros in lanes L:128); the wrapper slices [..., :L].
            h_ref[br] = jnp.concatenate(
                [x, jnp.zeros((S, 128 - L), jnp.float32)], axis=1)

            # Projector: Linear(L,256) [BN folded] -> ReLU -> Linear(256,128).
            # The 256 hidden dim is split into two exact 128-lane halves (ReLU is elementwise).
            p0 = jnp.maximum(jnp.dot(x, rd(w_ref, br, "wp1a"),
                                     preferred_element_type=jnp.float32)
                             + rd(w_ref, br, "bp1a"), 0.0)
            p1 = jnp.maximum(jnp.dot(x, rd(w_ref, br, "wp1b"),
                                     preferred_element_type=jnp.float32)
                             + rd(w_ref, br, "bp1b"), 0.0)
            z_ref[br] = (jnp.dot(p0, rd(w_ref, br, "wp2a"),
                                 preferred_element_type=jnp.float32)
                         + jnp.dot(p1, rd(w_ref, br, "wp2b"),
                                   preferred_element_type=jnp.float32)
                         + rd(w_ref, br, "bp2"))

    return kernel


def tfc_forward(x_t, x_f, w_slab, layout, L):
    """Both branches (time & freq) in ONE grid-less pallas_call (2 inputs, 2 outputs)."""
    B, _ = x_t.shape
    x = jnp.stack([x_t, x_f], axis=0)                                # (2, B, T_in)
    kernel = make_tfc_kernel(layout, L)
    # Everything (x + one weight slab + outputs, ~0.5 MiB) sits in VMEM for a single
    # invocation; no grid, no tiling, no VMEM tuning needed on v5e/v6e/v7x.
    h, z = pl.pallas_call(
        kernel,
        out_shape=(jax.ShapeDtypeStruct((2, B, 128), jnp.float32),   # lane-dense h
                   jax.ShapeDtypeStruct((2, B, 128), jnp.float32)),  # z (naturally 128-wide)
        cost_estimate=pl.CostEstimate(flops=1_400_000, transcendentals=512,
                                      bytes_accessed=520_000),
    )(x, w_slab)
    return h[0, :, :L], z[0], h[1, :, :L], z[1]


if __name__ == "__main__":
    B, C, T_IN, L = 8, 1, 32, 16  # configs.TSlength_aligned = 16; C must be 1 (see header)
    key = jax.random.PRNGKey(0)
    kx_t, kx_f, kp_t, kp_f = jax.random.split(key, 4)

    x_in_t = jax.random.normal(kx_t, (B, C, T_IN), dtype=jnp.float32)
    x_in_f = jax.random.normal(kx_f, (B, C, T_IN), dtype=jnp.float32)

    pool_mat = adaptive_avgpool_matrix(T_IN, L)
    layout, total_rows = build_layout(T_IN, L)
    slab_t = init_branch_slab(kp_t, T_IN, L, pool_mat, layout, total_rows)
    slab_f = init_branch_slab(kp_f, T_IN, L, pool_mat, layout, total_rows)
    w_slab = jnp.stack([slab_t, slab_f], axis=0)                     # (2, total_rows, 128)

    h_time, z_time, h_freq, z_freq = tfc_forward(
        x_in_t[:, 0, :], x_in_f[:, 0, :], w_slab, layout, L)

    for o in (h_time, z_time, h_freq, z_freq):
        jax.block_until_ready(o)

    assert h_time.shape == (B, C * L) and z_time.shape == (B, 128)
    assert h_freq.shape == (B, C * L) and z_freq.shape == (B, 128)
    assert all(bool(jnp.all(jnp.isfinite(o))) for o in (h_time, z_time, h_freq, z_freq))
    print("KERNEL_OK")
</pallas_src>

<mosaic_0001>
module attributes {stable_mosaic.version = 11 : i64} {
  func.func @kernel(%arg0: memref<2x8x32xf32, #tpu.memory_space<vmem>>, %arg1: memref<2x488x128xf32, #tpu.memory_space<vmem>>, %arg2: memref<2x8x128xf32, #tpu.memory_space<vmem>>, %arg3: memref<2x8x128xf32, #tpu.memory_space<vmem>>) attributes {dimension_semantics = [], scalar_prefetch = 0 : i64, scratch_operands = 0 : i64, tpu.core_type = #tpu.core_type<tc>} {
    %0 = tpu.iota {dimensions = array<i32: 0>} : vector<16x16xi32>
    %1 = tpu.iota {dimensions = array<i32: 1>} : vector<16x16xi32>
    %c8_i32 = arith.constant 8 : i32
    %2 = vector.broadcast %c8_i32 : i32 to vector<16x16xi32>
    %3 = arith.cmpi slt, %0, %2 : vector<16x16xi32>
    %c8_i32_0 = arith.constant 8 : i32
    %4 = vector.broadcast %c8_i32_0 : i32 to vector<16x16xi32>
    %5 = arith.cmpi slt, %1, %4 : vector<16x16xi32>
    %6 = arith.xori %3, %5 : vector<16x16xi1>
    %cst = arith.constant dense<true> : vector<16x16xi1>
    %7 = arith.xori %6, %cst : vector<16x16xi1>
    %8 = arith.extui %7 : vector<16x16xi1> to vector<16x16xi32>
    %9 = arith.sitofp %8 : vector<16x16xi32> to vector<16x16xf32>
    %10 = tpu.iota {dimensions = array<i32: 1>} : vector<8x16xi32>
    %c8_i32_1 = arith.constant 8 : i32
    %11 = vector.broadcast %c8_i32_1 : i32 to vector<8x16xi32>
    %12 = arith.cmpi slt, %10, %11 : vector<8x16xi32>
    %c0 = arith.constant 0 : index
    %c0_2 = arith.constant 0 : index
    %c0_3 = arith.constant 0 : index
    %13 = vector.load %arg0[%c0, %c0_2, %c0_3] : memref<2x8x32xf32, #tpu.memory_space<vmem>>, vector<1x8x32xf32>
    %14 = vector.shape_cast %13 : vector<1x8x32xf32> to vector<8x32xf32>
    %c0_4 = arith.constant 0 : index
    %c0_5 = arith.constant 0 : index
    %c0_6 = arith.constant 0 : index
    %15 = vector.load %arg1[%c0_4, %c0_5, %c0_6] : memref<2x488x128xf32, #tpu.memory_space<vmem>>, vector<1x32x64xf32>
    %16 = vector.shape_cast %15 : vector<1x32x64xf32> to vector<32x64xf32>
    %cst_7 = arith.constant dense<0.000000e+00> : vector<8x64xf32>
    %17 = tpu.matmul %14, %16, %cst_7 {dimension_numbers = #tpu.dot_dimension_numbers<[1], [0], [0], [1], [0, 0, 1, 1], [], []>} : vector<8x32xf32>, vector<32x64xf32>, vector<8x64xf32> -> vector<8x64xf32>
    %c0_8 = arith.constant 0 : index
    %c464 = arith.constant 464 : index
    %c0_9 = arith.constant 0 : index
    %18 = vector.load %arg1[%c0_8, %c464, %c0_9] : memref<2x488x128xf32, #tpu.memory_space<vmem>>, vector<1x1x64xf32>
    %19 = vector.shape_cast %18 : vector<1x1x64xf32> to vector<1x64xf32>
    %20 = vector.broadcast %19 : vector<1x64xf32> to vector<8x64xf32>
    %21 = arith.addf %17, %20 : vector<8x64xf32>
    %22 = vector.extract_strided_slice %21 {offsets = [0, 0], sizes = [8, 16], strides = [1, 1]} : vector<8x64xf32> to vector<8x16xf32>
    %23 = vector.extract_strided_slice %21 {offsets = [0, 16], sizes = [8, 48], strides = [1, 1]} : vector<8x64xf32> to vector<8x48xf32>
    %c0_10 = arith.constant 0 : index
    %c48 = arith.constant 48 : index
    %c0_11 = arith.constant 0 : index
    %24 = vector.load %arg1[%c0_10, %c48, %c0_11] : memref<2x488x128xf32, #tpu.memory_space<vmem>>, vector<1x16x16xf32>
    %25 = vector.shape_cast %24 : vector<1x16x16xf32> to vector<16x16xf32>
    %c0_12 = arith.constant 0 : index
    %c466 = arith.constant 466 : index
    %c0_13 = arith.constant 0 : index
    %26 = vector.load %arg1[%c0_12, %c466, %c0_13] : memref<2x488x128xf32, #tpu.memory_space<vmem>>, vector<1x1x16xf32>
    %27 = vector.shape_cast %26 : vector<1x1x16xf32> to vector<1x16xf32>
    %c0_14 = arith.constant 0 : index
    %c80 = arith.constant 80 : index
    %c0_15 = arith.constant 0 : index
    %28 = vector.load %arg1[%c0_14, %c80, %c0_15] : memref<2x488x128xf32, #tpu.memory_space<vmem>>, vector<1x16x32xf32>
    %29 = vector.shape_cast %28 : vector<1x16x32xf32> to vector<16x32xf32>
    %c0_16 = arith.constant 0 : index
    %c468 = arith.constant 468 : index
    %c0_17 = arith.constant 0 : index
    %30 = vector.load %arg1[%c0_16, %c468, %c0_17] : memref<2x488x128xf32, #tpu.memory_space<vmem>>, vector<1x1x32xf32>
    %31 = vector.shape_cast %30 : vector<1x1x32xf32> to vector<1x32xf32>
    %c0_18 = arith.constant 0 : index
    %c112 = arith.constant 112 : index
    %c0_19 = arith.constant 0 : index
    %32 = vector.load %arg1[%c0_18, %c112, %c0_19] : memref<2x488x128xf32, #tpu.memory_space<vmem>>, vector<1x32x16xf32>
    %33 = vector.shape_cast %32 : vector<1x32x16xf32> to vector<32x16xf32>
    %c0_20 = arith.constant 0 : index
    %c470 = arith.constant 470 : index
    %c0_21 = arith.constant 0 : index
    %34 = vector.load %arg1[%c0_20, %c470, %c0_21] : memref<2x488x128xf32, #tpu.memory_space<vmem>>, vector<1x1x16xf32>
    %35 = vector.shape_cast %34 : vector<1x1x16xf32> to vector<1x16xf32>
    %c0_22 = arith.constant 0 : index
    %c472 = arith.constant 472 : index
    %c0_23 = arith.constant 0 : index
    %36 = vector.load %arg1[%c0_22, %c472, %c0_23] : memref<2x488x128xf32, #tpu.memory_space<vmem>>, vector<1x1x16xf32>
    %37 = vector.shape_cast %36 : vector<1x1x16xf32> to vector<1x16xf32>
    %c0_24 = arith.constant 0 : index
    %c473 = arith.constant 473 : index
    %c0_25 = arith.constant 0 : index
    %38 = vector.load %arg1[%c0_24, %c473, %c0_25] : memref<2x488x128xf32, #tpu.memory_space<vmem>>, vector<1x1x16xf32>
    %39 = vector.shape_cast %38 : vector<1x1x16xf32> to vector<1x16xf32>
    %c0_26 = arith.constant 0 : index
    %c474 = arith.constant 474 : index
    %c0_27 = arith.constant 0 : index
    %40 = vector.load %arg1[%c0_26, %c474, %c0_27] : memref<2x488x128xf32, #tpu.memory_space<vmem>>, vector<1x1x16xf32>
    %41 = vector.shape_cast %40 : vector<1x1x16xf32> to vector<1x16xf32>
    %c0_28 = arith.constant 0 : index
    %c475 = arith.constant 475 : index
    %c0_29 = arith.constant 0 : index
    %42 = vector.load %arg1[%c0_28, %c475, %c0_29] : memref<2x488x128xf32, #tpu.memory_space<vmem>>, vector<1x1x16xf32>
    %43 = vector.shape_cast %42 : vector<1x1x16xf32> to vector<1x16xf32>
    %44 = vector.extract_strided_slice %23 {offsets = [0, 0], sizes = [8, 16], strides = [1, 1]} : vector<8x48xf32> to vector<8x16xf32>
    %45 = vector.extract_strided_slice %23 {offsets = [0, 16], sizes = [8, 16], strides = [1, 1]} : vector<8x48xf32> to vector<8x16xf32>
    %46 = vector.extract_strided_slice %23 {offsets = [0, 32], sizes = [8, 16], strides = [1, 1]} : vector<8x48xf32> to vector<8x16xf32>
    %47 = tpu.concatenate %45, %45 in 0 : vector<8x16xf32>, vector<8x16xf32> -> vector<16x16xf32>
    %48 = arith.mulf %47, %9 : vector<16x16xf32>
    %49 = tpu.concatenate %46, %46 in 0 : vector<8x16xf32>, vector<8x16xf32> -> vector<16x16xf32>
    %50 = arith.mulf %49, %9 : vector<16x16xf32>
    %cst_30 = arith.constant dense<0.000000e+00> : vector<8x16xf32>
    %51 = tpu.matmul %44, %48, %cst_30 {dimension_numbers = #tpu.dot_dimension_numbers<[1], [1], [0], [0], [0, 0, 1, 0], [], []>} : vector<8x16xf32>, vector<16x16xf32>, vector<8x16xf32> -> vector<8x16xf32>
    %cst_31 = arith.constant -1.000000e+30 : f32
    %52 = vector.broadcast %cst_31 : f32 to vector<8x16xf32>
    %53 = arith.select %12, %51, %52 : vector<8x16xi1>, vector<8x16xf32>
    %cst_32 = arith.constant dense<0xFF800000> : vector<8xf32>
    %54 = vector.multi_reduction <maximumf>, %53, %cst_32 [1] : vector<8x16xf32> to vector<8xf32>
    %55 = vector.shape_cast %54 : vector<8xf32> to vector<8x1xf32>
    %cst_33 = arith.constant -1.000000e+30 : f32
    %56 = vector.broadcast %cst_33 : f32 to vector<8x16xf32>
    %57 = arith.select %12, %56, %51 : vector<8x16xi1>, vector<8x16xf32>
    %cst_34 = arith.constant dense<0xFF800000> : vector<8xf32>
    %58 = vector.multi_reduction <maximumf>, %57, %cst_34 [1] : vector<8x16xf32> to vector<8xf32>
    %59 = vector.shape_cast %58 : vector<8xf32> to vector<8x1xf32>
    %60 = vector.shape_cast %55 : vector<8x1xf32> to vector<8x1xf32>
    %61 = vector.broadcast %60 : vector<8x1xf32> to vector<8x16xf32>
    %62 = vector.shape_cast %59 : vector<8x1xf32> to vector<8x1xf32>
    %63 = vector.broadcast %62 : vector<8x1xf32> to vector<8x16xf32>
    %64 = arith.select %12, %61, %63 : vector<8x16xi1>, vector<8x16xf32>
    %65 = arith.subf %51, %64 : vector<8x16xf32>
    %66 = math.exp %65 : vector<8x16xf32>
    %cst_35 = arith.constant 0.000000e+00 : f32
    %67 = vector.broadcast %cst_35 : f32 to vector<8x16xf32>
    %68 = arith.select %12, %66, %67 : vector<8x16xi1>, vector<8x16xf32>
    %cst_36 = arith.constant dense<0.000000e+00> : vector<8xf32>
    %69 = vector.multi_reduction <add>, %68, %cst_36 [1] : vector<8x16xf32> to vector<8xf32>
    %70 = vector.shape_cast %69 : vector<8xf32> to vector<8x1xf32>
    %cst_37 = arith.constant 0.000000e+00 : f32
    %71 = vector.broadcast %cst_37 : f32 to vector<8x16xf32>
    %72 = arith.select %12, %71, %66 : vector<8x16xi1>, vector<8x16xf32>
    %cst_38 = arith.constant dense<0.000000e+00> : vector<8xf32>
    %73 = vector.multi_reduction <add>, %72, %cst_38 [1] : vector<8x16xf32> to vector<8xf32>
    %74 = vector.shape_cast %73 : vector<8xf32> to vector<8x1xf32>
    %75 = vector.shape_cast %70 : vector<8x1xf32> to vector<8x1xf32>
    %76 = vector.broadcast %75 : vector<8x1xf32> to vector<8x16xf32>
    %77 = vector.shape_cast %74 : vector<8x1xf32> to vector<8x1xf32>
    %78 = vector.broadcast %77 : vector<8x1xf32> to vector<8x16xf32>
    %79 = arith.select %12, %76, %78 : vector<8x16xi1>, vector<8x16xf32>
    %80 = tpu.reciprocal %79 {approx = true} : vector<8x16xf32> -> vector<8x16xf32>
    %81 = arith.mulf %66, %80 : vector<8x16xf32>
    %cst_39 = arith.constant dense<0.000000e+00> : vector<8x16xf32>
    %82 = tpu.matmul %81, %50, %cst_39 {dimension_numbers = #tpu.dot_dimension_numbers<[1], [0], [0], [1], [0, 0, 1, 1], [], []>} : vector<8x16xf32>, vector<16x16xf32>, vector<8x16xf32> -> vector<8x16xf32>
    %cst_40 = arith.constant dense<0.000000e+00> : vector<8x16xf32>
    %83 = tpu.matmul %82, %25, %cst_40 {dimension_numbers = #tpu.dot_dimension_numbers<[1], [0], [0], [1], [0, 0, 1, 1], [], []>} : vector<8x16xf32>, vector<16x16xf32>, vector<8x16xf32> -> vector<8x16xf32>
    %84 = vector.broadcast %27 : vector<1x16xf32> to vector<8x16xf32>
    %85 = arith.addf %83, %84 : vector<8x16xf32>
    %86 = arith.addf %22, %85 : vector<8x16xf32>
    %cst_41 = arith.constant dense<0.000000e+00> : vector<8xf32>
    %87 = vector.multi_reduction <add>, %86, %cst_41 [1] : vector<8x16xf32> to vector<8xf32>
    %88 = vector.shape_cast %87 : vector<8xf32> to vector<8x1xf32>
    %cst_42 = arith.constant 1.600000e+01 : f32
    %89 = vector.broadcast %cst_42 : f32 to vector<8x1xf32>
    %90 = arith.divf %88, %89 : vector<8x1xf32>
    %91 = vector.broadcast %90 : vector<8x1xf32> to vector<8x16xf32>
    %92 = arith.subf %86, %91 : vector<8x16xf32>
    %93 = arith.mulf %92, %92 : vector<8x16xf32>
    %cst_43 = arith.constant dense<0.000000e+00> : vector<8xf32>
    %94 = vector.multi_reduction <add>, %93, %cst_43 [1] : vector<8x16xf32> to vector<8xf32>
    %95 = vector.shape_cast %94 : vector<8xf32> to vector<8x1xf32>
    %cst_44 = arith.constant 1.600000e+01 : f32
    %96 = vector.broadcast %cst_44 : f32 to vector<8x1xf32>
    %97 = arith.divf %95, %96 : vector<8x1xf32>
    %98 = vector.broadcast %90 : vector<8x1xf32> to vector<8x16xf32>
    %99 = arith.subf %86, %98 : vector<8x16xf32>
    %cst_45 = arith.constant 9.99999974E-6 : f32
    %100 = vector.broadcast %cst_45 : f32 to vector<8x1xf32>
    %101 = arith.addf %97, %100 : vector<8x1xf32>
    %102 = math.rsqrt %101 : vector<8x1xf32>
    %103 = vector.broadcast %102 : vector<8x1xf32> to vector<8x16xf32>
    %104 = arith.mulf %99, %103 : vector<8x16xf32>
    %105 = vector.broadcast %37 : vector<1x16xf32> to vector<8x16xf32>
    %106 = arith.mulf %104, %105 : vector<8x16xf32>
    %107 = vector.broadcast %39 : vector<1x16xf32> to vector<8x16xf32>
    %108 = arith.addf %106, %107 : vector<8x16xf32>
    %cst_46 = arith.constant dense<0.000000e+00> : vector<8x32xf32>
    %109 = tpu.matmul %108, %29, %cst_46 {dimension_numbers = #tpu.dot_dimension_numbers<[1], [0], [0], [1], [0, 0, 1, 1], [], []>} : vector<8x16xf32>, vector<16x32xf32>, vector<8x32xf32> -> vector<8x32xf32>
    %110 = vector.broadcast %31 : vector<1x32xf32> to vector<8x32xf32>
    %111 = arith.addf %109, %110 : vector<8x32xf32>
    %cst_47 = arith.constant 0.000000e+00 : f32
    %112 = vector.broadcast %cst_47 : f32 to vector<8x32xf32>
    %113 = arith.maximumf %111, %112 : vector<8x32xf32>
    %cst_48 = arith.constant dense<0.000000e+00> : vector<8x16xf32>
    %114 = tpu.matmul %113, %33, %cst_48 {dimension_numbers = #tpu.dot_dimension_numbers<[1], [0], [0], [1], [0, 0, 1, 1], [], []>} : vector<8x32xf32>, vector<32x16xf32>, vector<8x16xf32> -> vector<8x16xf32>
    %115 = vector.broadcast %35 : vector<1x16xf32> to vector<8x16xf32>
    %116 = arith.addf %114, %115 : vector<8x16xf32>
    %117 = arith.addf %108, %116 : vector<8x16xf32>
    %cst_49 = arith.constant dense<0.000000e+00> : vector<8xf32>
    %118 = vector.multi_reduction <add>, %117, %cst_49 [1] : vector<8x16xf32> to vector<8xf32>
    %119 = vector.shape_cast %118 : vector<8xf32> to vector<8x1xf32>
    %cst_50 = arith.constant 1.600000e+01 : f32
    %120 = vector.broadcast %cst_50 : f32 to vector<8x1xf32>
    %121 = arith.divf %119, %120 : vector<8x1xf32>
    %122 = vector.broadcast %121 : vector<8x1xf32> to vector<8x16xf32>
    %123 = arith.subf %117, %122 : vector<8x16xf32>
    %124 = arith.mulf %123, %123 : vector<8x16xf32>
    %cst_51 = arith.constant dense<0.000000e+00> : vector<8xf32>
    %125 = vector.multi_reduction <add>, %124, %cst_51 [1] : vector<8x16xf32> to vector<8xf32>
    %126 = vector.shape_cast %125 : vector<8xf32> to vector<8x1xf32>
    %cst_52 = arith.constant 1.600000e+01 : f32
    %127 = vector.broadcast %cst_52 : f32 to vector<8x1xf32>
    %128 = arith.divf %126, %127 : vector<8x1xf32>
    %129 = vector.broadcast %121 : vector<8x1xf32> to vector<8x16xf32>
    %130 = arith.subf %117, %129 : vector<8x16xf32>
    %cst_53 = arith.constant 9.99999974E-6 : f32
    %131 = vector.broadcast %cst_53 : f32 to vector<8x1xf32>
    %132 = arith.addf %128, %131 : vector<8x1xf32>
    %133 = math.rsqrt %132 : vector<8x1xf32>
    %134 = vector.broadcast %133 : vector<8x1xf32> to vector<8x16xf32>
    %135 = arith.mulf %130, %134 : vector<8x16xf32>
    %136 = vector.broadcast %41 : vector<1x16xf32> to vector<8x16xf32>
    %137 = arith.mulf %135, %136 : vector<8x16xf32>
    %138 = vector.broadcast %43 : vector<1x16xf32> to vector<8x16xf32>
    %139 = arith.addf %137, %138 : vector<8x16xf32>
    %c0_54 = arith.constant 0 : index
    %c32 = arith.constant 32 : index
    %c0_55 = arith.constant 0 : index
    %140 = vector.load %arg1[%c0_54, %c32, %c0_55] : memref<2x488x128xf32, #tpu.memory_space<vmem>>, vector<1x16x48xf32>
    %141 = vector.shape_cast %140 : vector<1x16x48xf32> to vector<16x48xf32>
    %cst_56 = arith.constant dense<0.000000e+00> : vector<8x48xf32>
    %142 = tpu.matmul %139, %141, %cst_56 {dimension_numbers = #tpu.dot_dimension_numbers<[1], [0], [0], [1], [0, 0, 1, 1], [], []>} : vector<8x16xf32>, vector<16x48xf32>, vector<8x48xf32> -> vector<8x48xf32>
    %c0_57 = arith.constant 0 : index
    %c465 = arith.constant 465 : index
    %c0_58 = arith.constant 0 : index
    %143 = vector.load %arg1[%c0_57, %c465, %c0_58] : memref<2x488x128xf32, #tpu.memory_space<vmem>>, vector<1x1x48xf32>
    %144 = vector.shape_cast %143 : vector<1x1x48xf32> to vector<1x48xf32>
    %145 = vector.broadcast %144 : vector<1x48xf32> to vector<8x48xf32>
    %146 = arith.addf %142, %145 : vector<8x48xf32>
    %c0_59 = arith.constant 0 : index
    %c64 = arith.constant 64 : index
    %c0_60 = arith.constant 0 : index
    %147 = vector.load %arg1[%c0_59, %c64, %c0_60] : memref<2x488x128xf32, #tpu.memory_space<vmem>>, vector<1x16x16xf32>
    %148 = vector.shape_cast %147 : vector<1x16x16xf32> to vector<16x16xf32>
    %c0_61 = arith.constant 0 : index
    %c467 = arith.constant 467 : index
    %c0_62 = arith.constant 0 : index
    %149 = vector.load %arg1[%c0_61, %c467, %c0_62] : memref<2x488x128xf32, #tpu.memory_space<vmem>>, vector<1x1x16xf32>
    %150 = vector.shape_cast %149 : vector<1x1x16xf32> to vector<1x16xf32>
    %c0_63 = arith.constant 0 : index
    %c96 = arith.constant 96 : index
    %c0_64 = arith.constant 0 : index
    %151 = vector.load %arg1[%c0_63, %c96, %c0_64] : memref<2x488x128xf32, #tpu.memory_space<vmem>>, vector<1x16x32xf32>
    %152 = vector.shape_cast %151 : vector<1x16x32xf32> to vector<16x32xf32>
    %c0_65 = arith.constant 0 : index
    %c469 = arith.constant 469 : index
    %c0_66 = arith.constant 0 : index
    %153 = vector.load %arg1[%c0_65, %c469, %c0_66] : memref<2x488x128xf32, #tpu.memory_space<vmem>>, vector<1x1x32xf32>
    %154 = vector.shape_cast %153 : vector<1x1x32xf32> to vector<1x32xf32>
    %c0_67 = arith.constant 0 : index
    %c144 = arith.constant 144 : index
    %c0_68 = arith.constant 0 : index
    %155 = vector.load %arg1[%c0_67, %c144, %c0_68] : memref<2x488x128xf32, #tpu.memory_space<vmem>>, vector<1x32x16xf32>
    %156 = vector.shape_cast %155 : vector<1x32x16xf32> to vector<32x16xf32>
    %c0_69 = arith.constant 0 : index
    %c471 = arith.constant 471 : index
    %c0_70 = arith.constant 0 : index
    %157 = vector.load %arg1[%c0_69, %c471, %c0_70] : memref<2x488x128xf32, #tpu.memory_space<vmem>>, vector<1x1x16xf32>
    %158 = vector.shape_cast %157 : vector<1x1x16xf32> to vector<1x16xf32>
    %c0_71 = arith.constant 0 : index
    %c476 = arith.constant 476 : index
    %c0_72 = arith.constant 0 : index
    %159 = vector.load %arg1[%c0_71, %c476, %c0_72] : memref<2x488x128xf32, #tpu.memory_space<vmem>>, vector<1x1x16xf32>
    %160 = vector.shape_cast %159 : vector<1x1x16xf32> to vector<1x16xf32>
    %c0_73 = arith.constant 0 : index
    %c477 = arith.constant 477 : index
    %c0_74 = arith.constant 0 : index
    %161 = vector.load %arg1[%c0_73, %c477, %c0_74] : memref<2x488x128xf32, #tpu.memory_space<vmem>>, vector<1x1x16xf32>
    %162 = vector.shape_cast %161 : vector<1x1x16xf32> to vector<1x16xf32>
    %c0_75 = arith.constant 0 : index
    %c478 = arith.constant 478 : index
    %c0_76 = arith.constant 0 : index
    %163 = vector.load %arg1[%c0_75, %c478, %c0_76] : memref<2x488x128xf32, #tpu.memory_space<vmem>>, vector<1x1x16xf32>
    %164 = vector.shape_cast %163 : vector<1x1x16xf32> to vector<1x16xf32>
    %c0_77 = arith.constant 0 : index
    %c479 = arith.constant 479 : index
    %c0_78 = arith.constant 0 : index
    %165 = vector.load %arg1[%c0_77, %c479, %c0_78] : memref<2x488x128xf32, #tpu.memory_space<vmem>>, vector<1x1x16xf32>
    %166 = vector.shape_cast %165 : vector<1x1x16xf32> to vector<1x16xf32>
    %167 = vector.extract_strided_slice %146 {offsets = [0, 0], sizes = [8, 16], strides = [1, 1]} : vector<8x48xf32> to vector<8x16xf32>
    %168 = vector.extract_strided_slice %146 {offsets = [0, 16], sizes = [8, 16], strides = [1, 1]} : vector<8x48xf32> to vector<8x16xf32>
    %169 = vector.extract_strided_slice %146 {offsets = [0, 32], sizes = [8, 16], strides = [1, 1]} : vector<8x48xf32> to vector<8x16xf32>
    %170 = tpu.concatenate %168, %168 in 0 : vector<8x16xf32>, vector<8x16xf32> -> vector<16x16xf32>
    %171 = arith.mulf %170, %9 : vector<16x16xf32>
    %172 = tpu.concatenate %169, %169 in 0 : vector<8x16xf32>, vector<8x16xf32> -> vector<16x16xf32>
    %173 = arith.mulf %172, %9 : vector<16x16xf32>
    %cst_79 = arith.constant dense<0.000000e+00> : vector<8x16xf32>
    %174 = tpu.matmul %167, %171, %cst_79 {dimension_numbers = #tpu.dot_dimension_numbers<[1], [1], [0], [0], [0, 0, 1, 0], [], []>} : vector<8x16xf32>, vector<16x16xf32>, vector<8x16xf32> -> vector<8x16xf32>
    %cst_80 = arith.constant -1.000000e+30 : f32
    %175 = vector.broadcast %cst_80 : f32 to vector<8x16xf32>
    %176 = arith.select %12, %174, %175 : vector<8x16xi1>, vector<8x16xf32>
    %cst_81 = arith.constant dense<0xFF800000> : vector<8xf32>
    %177 = vector.multi_reduction <maximumf>, %176, %cst_81 [1] : vector<8x16xf32> to vector<8xf32>
    %178 = vector.shape_cast %177 : vector<8xf32> to vector<8x1xf32>
    %cst_82 = arith.constant -1.000000e+30 : f32
    %179 = vector.broadcast %cst_82 : f32 to vector<8x16xf32>
    %180 = arith.select %12, %179, %174 : vector<8x16xi1>, vector<8x16xf32>
    %cst_83 = arith.constant dense<0xFF800000> : vector<8xf32>
    %181 = vector.multi_reduction <maximumf>, %180, %cst_83 [1] : vector<8x16xf32> to vector<8xf32>
    %182 = vector.shape_cast %181 : vector<8xf32> to vector<8x1xf32>
    %183 = vector.shape_cast %178 : vector<8x1xf32> to vector<8x1xf32>
    %184 = vector.broadcast %183 : vector<8x1xf32> to vector<8x16xf32>
    %185 = vector.shape_cast %182 : vector<8x1xf32> to vector<8x1xf32>
    %186 = vector.broadcast %185 : vector<8x1xf32> to vector<8x16xf32>
    %187 = arith.select %12, %184, %186 : vector<8x16xi1>, vector<8x16xf32>
    %188 = arith.subf %174, %187 : vector<8x16xf32>
    %189 = math.exp %188 : vector<8x16xf32>
    %cst_84 = arith.constant 0.000000e+00 : f32
    %190 = vector.broadcast %cst_84 : f32 to vector<8x16xf32>
    %191 = arith.select %12, %189, %190 : vector<8x16xi1>, vector<8x16xf32>
    %cst_85 = arith.constant dense<0.000000e+00> : vector<8xf32>
    %192 = vector.multi_reduction <add>, %191, %cst_85 [1] : vector<8x16xf32> to vector<8xf32>
    %193 = vector.shape_cast %192 : vector<8xf32> to vector<8x1xf32>
    %cst_86 = arith.constant 0.000000e+00 : f32
    %194 = vector.broadcast %cst_86 : f32 to vector<8x16xf32>
    %195 = arith.select %12, %194, %189 : vector<8x16xi1>, vector<8x16xf32>
    %cst_87 = arith.constant dense<0.000000e+00> : vector<8xf32>
    %196 = vector.multi_reduction <add>, %195, %cst_87 [1] : vector<8x16xf32> to vector<8xf32>
    %197 = vector.shape_cast %196 : vector<8xf32> to vector<8x1xf32>
    %198 = vector.shape_cast %193 : vector<8x1xf32> to vector<8x1xf32>
    %199 = vector.broadcast %198 : vector<8x1xf32> to vector<8x16xf32>
    %200 = vector.shape_cast %197 : vector<8x1xf32> to vector<8x1xf32>
    %201 = vector.broadcast %200 : vector<8x1xf32> to vector<8x16xf32>
    %202 = arith.select %12, %199, %201 : vector<8x16xi1>, vector<8x16xf32>
    %203 = tpu.reciprocal %202 {approx = true} : vector<8x16xf32> -> vector<8x16xf32>
    %204 = arith.mulf %189, %203 : vector<8x16xf32>
    %cst_88 = arith.constant dense<0.000000e+00> : vector<8x16xf32>
    %205 = tpu.matmul %204, %173, %cst_88 {dimension_numbers = #tpu.dot_dimension_numbers<[1], [0], [0], [1], [0, 0, 1, 1], [], []>} : vector<8x16xf32>, vector<16x16xf32>, vector<8x16xf32> -> vector<8x16xf32>
    %cst_89 = arith.constant dense<0.000000e+00> : vector<8x16xf32>
    %206 = tpu.matmul %205, %148, %cst_89 {dimension_numbers = #tpu.dot_dimension_numbers<[1], [0], [0], [1], [0, 0, 1, 1], [], []>} : vector<8x16xf32>, vector<16x16xf32>, vector<8x16xf32> -> vector<8x16xf32>
    %207 = vector.broadcast %150 : vector<1x16xf32> to vector<8x16xf32>
    %208 = arith.addf %206, %207 : vector<8x16xf32>
    %209 = arith.addf %139, %208 : vector<8x16xf32>
    %cst_90 = arith.constant dense<0.000000e+00> : vector<8xf32>
    %210 = vector.multi_reduction <add>, %209, %cst_90 [1] : vector<8x16xf32> to vector<8xf32>
    %211 = vector.shape_cast %210 : vector<8xf32> to vector<8x1xf32>
    %cst_91 = arith.constant 1.600000e+01 : f32
    %212 = vector.broadcast %cst_91 : f32 to vector<8x1xf32>
    %213 = arith.divf %211, %212 : vector<8x1xf32>
    %214 = vector.broadcast %213 : vector<8x1xf32> to vector<8x16xf32>
    %215 = arith.subf %209, %214 : vector<8x16xf32>
    %216 = arith.mulf %215, %215 : vector<8x16xf32>
    %cst_92 = arith.constant dense<0.000000e+00> : vector<8xf32>
    %217 = vector.multi_reduction <add>, %216, %cst_92 [1] : vector<8x16xf32> to vector<8xf32>
    %218 = vector.shape_cast %217 : vector<8xf32> to vector<8x1xf32>
    %cst_93 = arith.constant 1.600000e+01 : f32
    %219 = vector.broadcast %cst_93 : f32 to vector<8x1xf32>
    %220 = arith.divf %218, %219 : vector<8x1xf32>
    %221 = vector.broadcast %213 : vector<8x1xf32> to vector<8x16xf32>
    %222 = arith.subf %209, %221 : vector<8x16xf32>
    %cst_94 = arith.constant 9.99999974E-6 : f32
    %223 = vector.broadcast %cst_94 : f32 to vector<8x1xf32>
    %224 = arith.addf %220, %223 : vector<8x1xf32>
    %225 = math.rsqrt %224 : vector<8x1xf32>
    %226 = vector.broadcast %225 : vector<8x1xf32> to vector<8x16xf32>
    %227 = arith.mulf %222, %226 : vector<8x16xf32>
    %228 = vector.broadcast %160 : vector<1x16xf32> to vector<8x16xf32>
    %229 = arith.mulf %227, %228 : vector<8x16xf32>
    %230 = vector.broadcast %162 : vector<1x16xf32> to vector<8x16xf32>
    %231 = arith.addf %229, %230 : vector<8x16xf32>
    %cst_95 = arith.constant dense<0.000000e+00> : vector<8x32xf32>
    %232 = tpu.matmul %231, %152, %cst_95 {dimension_numbers = #tpu.dot_dimension_numbers<[1], [0], [0], [1], [0, 0, 1, 1], [], []>} : vector<8x16xf32>, vector<16x32xf32>, vector<8x32xf32> -> vector<8x32xf32>
    %233 = vector.broadcast %154 : vector<1x32xf32> to vector<8x32xf32>
    %234 = arith.addf %232, %233 : vector<8x32xf32>
    %cst_96 = arith.constant 0.000000e+00 : f32
    %235 = vector.broadcast %cst_96 : f32 to vector<8x32xf32>
    %236 = arith.maximumf %234, %235 : vector<8x32xf32>
    %cst_97 = arith.constant dense<0.000000e+00> : vector<8x16xf32>
    %237 = tpu.matmul %236, %156, %cst_97 {dimension_numbers = #tpu.dot_dimension_numbers<[1], [0], [0], [1], [0, 0, 1, 1], [], []>} : vector<8x32xf32>, vector<32x16xf32>, vector<8x16xf32> -> vector<8x16xf32>
    %238 = vector.broadcast %158 : vector<1x16xf32> to vector<8x16xf32>
    %239 = arith.addf %237, %238 : vector<8x16xf32>
    %240 = arith.addf %231, %239 : vector<8x16xf32>
    %cst_98 = arith.constant dense<0.000000e+00> : vector<8xf32>
    %241 = vector.multi_reduction <add>, %240, %cst_98 [1] : vector<8x16xf32> to vector<8xf32>
    %242 = vector.shape_cast %241 : vector<8xf32> to vector<8x1xf32>
    %cst_99 = arith.constant 1.600000e+01 : f32
    %243 = vector.broadcast %cst_99 : f32 to vector<8x1xf32>
    %244 = arith.divf %242, %243 : vector<8x1xf32>
    %245 = vector.broadcast %244 : vector<8x1xf32> to vector<8x16xf32>
    %246 = arith.subf %240, %245 : vector<8x16xf32>
    %247 = arith.mulf %246, %246 : vector<8x16xf32>
    %cst_100 = arith.constant dense<0.000000e+00> : vector<8xf32>
    %248 = vector.multi_reduction <add>, %247, %cst_100 [1] : vector<8x16xf32> to vector<8xf32>
    %249 = vector.shape_cast %248 : vector<8xf32> to vector<8x1xf32>
    %cst_101 = arith.constant 1.600000e+01 : f32
    %250 = vector.broadcast %cst_101 : f32 to vector<8x1xf32>
    %251 = arith.divf %249, %250 : vector<8x1xf32>
    %252 = vector.broadcast %244 : vector<8x1xf32> to vector<8x16xf32>
    %253 = arith.subf %240, %252 : vector<8x16xf32>
    %cst_102 = arith.constant 9.99999974E-6 : f32
    %254 = vector.broadcast %cst_102 : f32 to vector<8x1xf32>
    %255 = arith.addf %251, %254 : vector<8x1xf32>
    %256 = math.rsqrt %255 : vector<8x1xf32>
    %257 = vector.broadcast %256 : vector<8x1xf32> to vector<8x16xf32>
    %258 = arith.mulf %253, %257 : vector<8x16xf32>
    %259 = vector.broadcast %164 : vector<1x16xf32> to vector<8x16xf32>
    %260 = arith.mulf %258, %259 : vector<8x16xf32>
    %261 = vector.broadcast %166 : vector<1x16xf32> to vector<8x16xf32>
    %262 = arith.addf %260, %261 : vector<8x16xf32>
    %cst_103 = arith.constant 0.000000e+00 : f32
    %263 = vector.broadcast %cst_103 : f32 to vector<8x112xf32>
    %264 = tpu.concatenate %262, %263 in 1 : vector<8x16xf32>, vector<8x112xf32> -> vector<8x128xf32>
    %c0_104 = arith.constant 0 : index
    %c0_105 = arith.constant 0 : index
    %c0_106 = arith.constant 0 : index
    %265 = vector.load %arg2[%c0_104, %c0_105, %c0_106] : memref<2x8x128xf32, #tpu.memory_space<vmem>>, vector<1x8x128xf32>
    %266 = vector.shape_cast %265 : vector<1x8x128xf32> to vector<8x128xf32>
    %267 = vector.shape_cast %264 : vector<8x128xf32> to vector<1x8x128xf32>
    tpu.vector_store %arg2[%c0_104, %c0_105, %c0_106], %267 {strides = array<i32>} : memref<2x8x128xf32, #tpu.memory_space<vmem>>, vector<1x8x128xf32>,
    %c0_107 = arith.constant 0 : index
    %c176 = arith.constant 176 : index
    %c0_108 = arith.constant 0 : index
    %268 = vector.load %arg1[%c0_107, %c176, %c0_108] : memref<2x488x128xf32, #tpu.memory_space<vmem>>, vector<1x16x128xf32>
    %269 = vector.shape_cast %268 : vector<1x16x128xf32> to vector<16x128xf32>
    %cst_109 = arith.constant dense<0.000000e+00> : vector<8x128xf32>
    %270 = tpu.matmul %262, %269, %cst_109 {dimension_numbers = #tpu.dot_dimension_numbers<[1], [0], [0], [1], [0, 0, 1, 1], [], []>} : vector<8x16xf32>, vector<16x128xf32>, vector<8x128xf32> -> vector<8x128xf32>
    %c0_110 = arith.constant 0 : index
    %c480 = arith.constant 480 : index
    %c0_111 = arith.constant 0 : index
    %271 = vector.load %arg1[%c0_110, %c480, %c0_111] : memref<2x488x128xf32, #tpu.memory_space<vmem>>, vector<1x1x128xf32>
    %272 = vector.shape_cast %271 : vector<1x1x128xf32> to vector<1x128xf32>
    %273 = vector.broadcast %272 : vector<1x128xf32> to vector<8x128xf32>
    %274 = arith.addf %270, %273 : vector<8x128xf32>
    %cst_112 = arith.constant 0.000000e+00 : f32
    %275 = vector.broadcast %cst_112 : f32 to vector<8x128xf32>
    %276 = arith.maximumf %274, %275 : vector<8x128xf32>
    %c0_113 = arith.constant 0 : index
    %c192 = arith.constant 192 : index
    %c0_114 = arith.constant 0 : index
    %277 = vector.load %arg1[%c0_113, %c192, %c0_114] : memref<2x488x128xf32, #tpu.memory_space<vmem>>, vector<1x16x128xf32>
    %278 = vector.shape_cast %277 : vector<1x16x128xf32> to vector<16x128xf32>
    %cst_115 = arith.constant dense<0.000000e+00> : vector<8x128xf32>
    %279 = tpu.matmul %262, %278, %cst_115 {dimension_numbers = #tpu.dot_dimension_numbers<[1], [0], [0], [1], [0, 0, 1, 1], [], []>} : vector<8x16xf32>, vector<16x128xf32>, vector<8x128xf32> -> vector<8x128xf32>
    %c0_116 = arith.constant 0 : index
    %c481 = arith.constant 481 : index
    %c0_117 = arith.constant 0 : index
    %280 = vector.load %arg1[%c0_116, %c481, %c0_117] : memref<2x488x128xf32, #tpu.memory_space<vmem>>, vector<1x1x128xf32>
    %281 = vector.shape_cast %280 : vector<1x1x128xf32> to vector<1x128xf32>
    %282 = vector.broadcast %281 : vector<1x128xf32> to vector<8x128xf32>
    %283 = arith.addf %279, %282 : vector<8x128xf32>
    %cst_118 = arith.constant 0.000000e+00 : f32
    %284 = vector.broadcast %cst_118 : f32 to vector<8x128xf32>
    %285 = arith.maximumf %283, %284 : vector<8x128xf32>
    %c0_119 = arith.constant 0 : index
    %c208 = arith.constant 208 : index
    %c0_120 = arith.constant 0 : index
    %286 = vector.load %arg1[%c0_119, %c208, %c0_120] : memref<2x488x128xf32, #tpu.memory_space<vmem>>, vector<1x128x128xf32>
    %287 = vector.shape_cast %286 : vector<1x128x128xf32> to vector<128x128xf32>
    %cst_121 = arith.constant dense<0.000000e+00> : vector<8x128xf32>
    %288 = tpu.matmul %276, %287, %cst_121 {dimension_numbers = #tpu.dot_dimension_numbers<[1], [0], [0], [1], [0, 0, 1, 1], [], []>} : vector<8x128xf32>, vector<128x128xf32>, vector<8x128xf32> -> vector<8x128xf32>
    %c0_122 = arith.constant 0 : index
    %c336 = arith.constant 336 : index
    %c0_123 = arith.constant 0 : index
    %289 = vector.load %arg1[%c0_122, %c336, %c0_123] : memref<2x488x128xf32, #tpu.memory_space<vmem>>, vector<1x128x128xf32>
    %290 = vector.shape_cast %289 : vector<1x128x128xf32> to vector<128x128xf32>
    %cst_124 = arith.constant dense<0.000000e+00> : vector<8x128xf32>
    %291 = tpu.matmul %285, %290, %cst_124 {dimension_numbers = #tpu.dot_dimension_numbers<[1], [0], [0], [1], [0, 0, 1, 1], [], []>} : vector<8x128xf32>, vector<128x128xf32>, vector<8x128xf32> -> vector<8x128xf32>
    %292 = arith.addf %288, %291 : vector<8x128xf32>
    %c0_125 = arith.constant 0 : index
    %c482 = arith.constant 482 : index
    %c0_126 = arith.constant 0 : index
    %293 = vector.load %arg1[%c0_125, %c482, %c0_126] : memref<2x488x128xf32, #tpu.memory_space<vmem>>, vector<1x1x128xf32>
    %294 = vector.shape_cast %293 : vector<1x1x128xf32> to vector<1x128xf32>
    %295 = vector.broadcast %294 : vector<1x128xf32> to vector<8x128xf32>
    %296 = arith.addf %292, %295 : vector<8x128xf32>
    %c0_127 = arith.constant 0 : index
    %c0_128 = arith.constant 0 : index
    %c0_129 = arith.constant 0 : index
    %297 = vector.load %arg3[%c0_127, %c0_128, %c0_129] : memref<2x8x128xf32, #tpu.memory_space<vmem>>, vector<1x8x128xf32>
    %298 = vector.shape_cast %297 : vector<1x8x128xf32> to vector<8x128xf32>
    %299 = vector.shape_cast %296 : vector<8x128xf32> to vector<1x8x128xf32>
    tpu.vector_store %arg3[%c0_127, %c0_128, %c0_129], %299 {strides = array<i32>} : memref<2x8x128xf32, #tpu.memory_space<vmem>>, vector<1x8x128xf32>,
    %c1 = arith.constant 1 : index
    %c0_130 = arith.constant 0 : index
    %c0_131 = arith.constant 0 : index
    %300 = vector.load %arg0[%c1, %c0_130, %c0_131] : memref<2x8x32xf32, #tpu.memory_space<vmem>>, vector<1x8x32xf32>
    %301 = vector.shape_cast %300 : vector<1x8x32xf32> to vector<8x32xf32>
    %c1_132 = arith.constant 1 : index
    %c0_133 = arith.constant 0 : index
    %c0_134 = arith.constant 0 : index
    %302 = vector.load %arg1[%c1_132, %c0_133, %c0_134] : memref<2x488x128xf32, #tpu.memory_space<vmem>>, vector<1x32x64xf32>
    %303 = vector.shape_cast %302 : vector<1x32x64xf32> to vector<32x64xf32>
    %cst_135 = arith.constant dense<0.000000e+00> : vector<8x64xf32>
    %304 = tpu.matmul %301, %303, %cst_135 {dimension_numbers = #tpu.dot_dimension_numbers<[1], [0], [0], [1], [0, 0, 1, 1], [], []>} : vector<8x32xf32>, vector<32x64xf32>, vector<8x64xf32> -> vector<8x64xf32>
    %c1_136 = arith.constant 1 : index
    %c464_137 = arith.constant 464 : index
    %c0_138 = arith.constant 0 : index
    %305 = vector.load %arg1[%c1_136, %c464_137, %c0_138] : memref<2x488x128xf32, #tpu.memory_space<vmem>>, vector<1x1x64xf32>
    %306 = vector.shape_cast %305 : vector<1x1x64xf32> to vector<1x64xf32>
    %307 = vector.broadcast %306 : vector<1x64xf32> to vector<8x64xf32>
    %308 = arith.addf %304, %307 : vector<8x64xf32>
    %309 = vector.extract_strided_slice %308 {offsets = [0, 0], sizes = [8, 16], strides = [1, 1]} : vector<8x64xf32> to vector<8x16xf32>
    %310 = vector.extract_strided_slice %308 {offsets = [0, 16], sizes = [8, 48], strides = [1, 1]} : vector<8x64xf32> to vector<8x48xf32>
    %c1_139 = arith.constant 1 : index
    %c48_140 = arith.constant 48 : index
    %c0_141 = arith.constant 0 : index
    %311 = vector.load %arg1[%c1_139, %c48_140, %c0_141] : memref<2x488x128xf32, #tpu.memory_space<vmem>>, vector<1x16x16xf32>
    %312 = vector.shape_cast %311 : vector<1x16x16xf32> to vector<16x16xf32>
    %c1_142 = arith.constant 1 : index
    %c466_143 = arith.constant 466 : index
    %c0_144 = arith.constant 0 : index
    %313 = vector.load %arg1[%c1_142, %c466_143, %c0_144] : memref<2x488x128xf32, #tpu.memory_space<vmem>>, vector<1x1x16xf32>
    %314 = vector.shape_cast %313 : vector<1x1x16xf32> to vector<1x16xf32>
    %c1_145 = arith.constant 1 : index
    %c80_146 = arith.constant 80 : index
    %c0_147 = arith.constant 0 : index
    %315 = vector.load %arg1[%c1_145, %c80_146, %c0_147] : memref<2x488x128xf32, #tpu.memory_space<vmem>>, vector<1x16x32xf32>
    %316 = vector.shape_cast %315 : vector<1x16x32xf32> to vector<16x32xf32>
    %c1_148 = arith.constant 1 : index
    %c468_149 = arith.constant 468 : index
    %c0_150 = arith.constant 0 : index
    %317 = vector.load %arg1[%c1_148, %c468_149, %c0_150] : memref<2x488x128xf32, #tpu.memory_space<vmem>>, vector<1x1x32xf32>
    %318 = vector.shape_cast %317 : vector<1x1x32xf32> to vector<1x32xf32>
    %c1_151 = arith.constant 1 : index
    %c112_152 = arith.constant 112 : index
    %c0_153 = arith.constant 0 : index
    %319 = vector.load %arg1[%c1_151, %c112_152, %c0_153] : memref<2x488x128xf32, #tpu.memory_space<vmem>>, vector<1x32x16xf32>
    %320 = vector.shape_cast %319 : vector<1x32x16xf32> to vector<32x16xf32>
    %c1_154 = arith.constant 1 : index
    %c470_155 = arith.constant 470 : index
    %c0_156 = arith.constant 0 : index
    %321 = vector.load %arg1[%c1_154, %c470_155, %c0_156] : memref<2x488x128xf32, #tpu.memory_space<vmem>>, vector<1x1x16xf32>
    %322 = vector.shape_cast %321 : vector<1x1x16xf32> to vector<1x16xf32>
    %c1_157 = arith.constant 1 : index
    %c472_158 = arith.constant 472 : index
    %c0_159 = arith.constant 0 : index
    %323 = vector.load %arg1[%c1_157, %c472_158, %c0_159] : memref<2x488x128xf32, #tpu.memory_space<vmem>>, vector<1x1x16xf32>
    %324 = vector.shape_cast %323 : vector<1x1x16xf32> to vector<1x16xf32>
    %c1_160 = arith.constant 1 : index
    %c473_161 = arith.constant 473 : index
    %c0_162 = arith.constant 0 : index
    %325 = vector.load %arg1[%c1_160, %c473_161, %c0_162] : memref<2x488x128xf32, #tpu.memory_space<vmem>>, vector<1x1x16xf32>
    %326 = vector.shape_cast %325 : vector<1x1x16xf32> to vector<1x16xf32>
    %c1_163 = arith.constant 1 : index
    %c474_164 = arith.constant 474 : index
    %c0_165 = arith.constant 0 : index
    %327 = vector.load %arg1[%c1_163, %c474_164, %c0_165] : memref<2x488x128xf32, #tpu.memory_space<vmem>>, vector<1x1x16xf32>
    %328 = vector.shape_cast %327 : vector<1x1x16xf32> to vector<1x16xf32>
    %c1_166 = arith.constant 1 : index
    %c475_167 = arith.constant 475 : index
    %c0_168 = arith.constant 0 : index
    %329 = vector.load %arg1[%c1_166, %c475_167, %c0_168] : memref<2x488x128xf32, #tpu.memory_space<vmem>>, vector<1x1x16xf32>
    %330 = vector.shape_cast %329 : vector<1x1x16xf32> to vector<1x16xf32>
    %331 = vector.extract_strided_slice %310 {offsets = [0, 0], sizes = [8, 16], strides = [1, 1]} : vector<8x48xf32> to vector<8x16xf32>
    %332 = vector.extract_strided_slice %310 {offsets = [0, 16], sizes = [8, 16], strides = [1, 1]} : vector<8x48xf32> to vector<8x16xf32>
    %333 = vector.extract_strided_slice %310 {offsets = [0, 32], sizes = [8, 16], strides = [1, 1]} : vector<8x48xf32> to vector<8x16xf32>
    %334 = tpu.concatenate %332, %332 in 0 : vector<8x16xf32>, vector<8x16xf32> -> vector<16x16xf32>
    %335 = arith.mulf %334, %9 : vector<16x16xf32>
    %336 = tpu.concatenate %333, %333 in 0 : vector<8x16xf32>, vector<8x16xf32> -> vector<16x16xf32>
    %337 = arith.mulf %336, %9 : vector<16x16xf32>
    %cst_169 = arith.constant dense<0.000000e+00> : vector<8x16xf32>
    %338 = tpu.matmul %331, %335, %cst_169 {dimension_numbers = #tpu.dot_dimension_numbers<[1], [1], [0], [0], [0, 0, 1, 0], [], []>} : vector<8x16xf32>, vector<16x16xf32>, vector<8x16xf32> -> vector<8x16xf32>
    %cst_170 = arith.constant -1.000000e+30 : f32
    %339 = vector.broadcast %cst_170 : f32 to vector<8x16xf32>
    %340 = arith.select %12, %338, %339 : vector<8x16xi1>, vector<8x16xf32>
    %cst_171 = arith.constant dense<0xFF800000> : vector<8xf32>
    %341 = vector.multi_reduction <maximumf>, %340, %cst_171 [1] : vector<8x16xf32> to vector<8xf32>
    %342 = vector.shape_cast %341 : vector<8xf32> to vector<8x1xf32>
    %cst_172 = arith.constant -1.000000e+30 : f32
    %343 = vector.broadcast %cst_172 : f32 to vector<8x16xf32>
    %344 = arith.select %12, %343, %338 : vector<8x16xi1>, vector<8x16xf32>
    %cst_173 = arith.constant dense<0xFF800000> : vector<8xf32>
    %345 = vector.multi_reduction <maximumf>, %344, %cst_173 [1] : vector<8x16xf32> to vector<8xf32>
    %346 = vector.shape_cast %345 : vector<8xf32> to vector<8x1xf32>
    %347 = vector.shape_cast %342 : vector<8x1xf32> to vector<8x1xf32>
    %348 = vector.broadcast %347 : vector<8x1xf32> to vector<8x16xf32>
    %349 = vector.shape_cast %346 : vector<8x1xf32> to vector<8x1xf32>
    %350 = vector.broadcast %349 : vector<8x1xf32> to vector<8x16xf32>
    %351 = arith.select %12, %348, %350 : vector<8x16xi1>, vector<8x16xf32>
    %352 = arith.subf %338, %351 : vector<8x16xf32>
    %353 = math.exp %352 : vector<8x16xf32>
    %cst_174 = arith.constant 0.000000e+00 : f32
    %354 = vector.broadcast %cst_174 : f32 to vector<8x16xf32>
    %355 = arith.select %12, %353, %354 : vector<8x16xi1>, vector<8x16xf32>
    %cst_175 = arith.constant dense<0.000000e+00> : vector<8xf32>
    %356 = vector.multi_reduction <add>, %355, %cst_175 [1] : vector<8x16xf32> to vector<8xf32>
    %357 = vector.shape_cast %356 : vector<8xf32> to vector<8x1xf32>
    %cst_176 = arith.constant 0.000000e+00 : f32
    %358 = vector.broadcast %cst_176 : f32 to vector<8x16xf32>
    %359 = arith.select %12, %358, %353 : vector<8x16xi1>, vector<8x16xf32>
    %cst_177 = arith.constant dense<0.000000e+00> : vector<8xf32>
    %360 = vector.multi_reduction <add>, %359, %cst_177 [1] : vector<8x16xf32> to vector<8xf32>
    %361 = vector.shape_cast %360 : vector<8xf32> to vector<8x1xf32>
    %362 = vector.shape_cast %357 : vector<8x1xf32> to vector<8x1xf32>
    %363 = vector.broadcast %362 : vector<8x1xf32> to vector<8x16xf32>
    %364 = vector.shape_cast %361 : vector<8x1xf32> to vector<8x1xf32>
    %365 = vector.broadcast %364 : vector<8x1xf32> to vector<8x16xf32>
    %366 = arith.select %12, %363, %365 : vector<8x16xi1>, vector<8x16xf32>
    %367 = tpu.reciprocal %366 {approx = true} : vector<8x16xf32> -> vector<8x16xf32>
    %368 = arith.mulf %353, %367 : vector<8x16xf32>
    %cst_178 = arith.constant dense<0.000000e+00> : vector<8x16xf32>
    %369 = tpu.matmul %368, %337, %cst_178 {dimension_numbers = #tpu.dot_dimension_numbers<[1], [0], [0], [1], [0, 0, 1, 1], [], []>} : vector<8x16xf32>, vector<16x16xf32>, vector<8x16xf32> -> vector<8x16xf32>
    %cst_179 = arith.constant dense<0.000000e+00> : vector<8x16xf32>
    %370 = tpu.matmul %369, %312, %cst_179 {dimension_numbers = #tpu.dot_dimension_numbers<[1], [0], [0], [1], [0, 0, 1, 1], [], []>} : vector<8x16xf32>, vector<16x16xf32>, vector<8x16xf32> -> vector<8x16xf32>
    %371 = vector.broadcast %314 : vector<1x16xf32> to vector<8x16xf32>
    %372 = arith.addf %370, %371 : vector<8x16xf32>
    %373 = arith.addf %309, %372 : vector<8x16xf32>
    %cst_180 = arith.constant dense<0.000000e+00> : vector<8xf32>
    %374 = vector.multi_reduction <add>, %373, %cst_180 [1] : vector<8x16xf32> to vector<8xf32>
    %375 = vector.shape_cast %374 : vector<8xf32> to vector<8x1xf32>
    %cst_181 = arith.constant 1.600000e+01 : f32
    %376 = vector.broadcast %cst_181 : f32 to vector<8x1xf32>
    %377 = arith.divf %375, %376 : vector<8x1xf32>
    %378 = vector.broadcast %377 : vector<8x1xf32> to vector<8x16xf32>
    %379 = arith.subf %373, %378 : vector<8x16xf32>
    %380 = arith.mulf %379, %379 : vector<8x16xf32>
    %cst_182 = arith.constant dense<0.000000e+00> : vector<8xf32>
    %381 = vector.multi_reduction <add>, %380, %cst_182 [1] : vector<8x16xf32> to vector<8xf32>
    %382 = vector.shape_cast %381 : vector<8xf32> to vector<8x1xf32>
    %cst_183 = arith.constant 1.600000e+01 : f32
    %383 = vector.broadcast %cst_183 : f32 to vector<8x1xf32>
    %384 = arith.divf %382, %383 : vector<8x1xf32>
    %385 = vector.broadcast %377 : vector<8x1xf32> to vector<8x16xf32>
    %386 = arith.subf %373, %385 : vector<8x16xf32>
    %cst_184 = arith.constant 9.99999974E-6 : f32
    %387 = vector.broadcast %cst_184 : f32 to vector<8x1xf32>
    %388 = arith.addf %384, %387 : vector<8x1xf32>
    %389 = math.rsqrt %388 : vector<8x1xf32>
    %390 = vector.broadcast %389 : vector<8x1xf32> to vector<8x16xf32>
    %391 = arith.mulf %386, %390 : vector<8x16xf32>
    %392 = vector.broadcast %324 : vector<1x16xf32> to vector<8x16xf32>
    %393 = arith.mulf %391, %392 : vector<8x16xf32>
    %394 = vector.broadcast %326 : vector<1x16xf32> to vector<8x16xf32>
    %395 = arith.addf %393, %394 : vector<8x16xf32>
    %cst_185 = arith.constant dense<0.000000e+00> : vector<8x32xf32>
    %396 = tpu.matmul %395, %316, %cst_185 {dimension_numbers = #tpu.dot_dimension_numbers<[1], [0], [0], [1], [0, 0, 1, 1], [], []>} : vector<8x16xf32>, vector<16x32xf32>, vector<8x32xf32> -> vector<8x32xf32>
    %397 = vector.broadcast %318 : vector<1x32xf32> to vector<8x32xf32>
    %398 = arith.addf %396, %397 : vector<8x32xf32>
    %cst_186 = arith.constant 0.000000e+00 : f32
    %399 = vector.broadcast %cst_186 : f32 to vector<8x32xf32>
    %400 = arith.maximumf %398, %399 : vector<8x32xf32>
    %cst_187 = arith.constant dense<0.000000e+00> : vector<8x16xf32>
    %401 = tpu.matmul %400, %320, %cst_187 {dimension_numbers = #tpu.dot_dimension_numbers<[1], [0], [0], [1], [0, 0, 1, 1], [], []>} : vector<8x32xf32>, vector<32x16xf32>, vector<8x16xf32> -> vector<8x16xf32>
    %402 = vector.broadcast %322 : vector<1x16xf32> to vector<8x16xf32>
    %403 = arith.addf %401, %402 : vector<8x16xf32>
    %404 = arith.addf %395, %403 : vector<8x16xf32>
    %cst_188 = arith.constant dense<0.000000e+00> : vector<8xf32>
    %405 = vector.multi_reduction <add>, %404, %cst_188 [1] : vector<8x16xf32> to vector<8xf32>
    %406 = vector.shape_cast %405 : vector<8xf32> to vector<8x1xf32>
    %cst_189 = arith.constant 1.600000e+01 : f32
    %407 = vector.broadcast %cst_189 : f32 to vector<8x1xf32>
    %408 = arith.divf %406, %407 : vector<8x1xf32>
    %409 = vector.broadcast %408 : vector<8x1xf32> to vector<8x16xf32>
    %410 = arith.subf %404, %409 : vector<8x16xf32>
    %411 = arith.mulf %410, %410 : vector<8x16xf32>
    %cst_190 = arith.constant dense<0.000000e+00> : vector<8xf32>
    %412 = vector.multi_reduction <add>, %411, %cst_190 [1] : vector<8x16xf32> to vector<8xf32>
    %413 = vector.shape_cast %412 : vector<8xf32> to vector<8x1xf32>
    %cst_191 = arith.constant 1.600000e+01 : f32
    %414 = vector.broadcast %cst_191 : f32 to vector<8x1xf32>
    %415 = arith.divf %413, %414 : vector<8x1xf32>
    %416 = vector.broadcast %408 : vector<8x1xf32> to vector<8x16xf32>
    %417 = arith.subf %404, %416 : vector<8x16xf32>
    %cst_192 = arith.constant 9.99999974E-6 : f32
    %418 = vector.broadcast %cst_192 : f32 to vector<8x1xf32>
    %419 = arith.addf %415, %418 : vector<8x1xf32>
    %420 = math.rsqrt %419 : vector<8x1xf32>
    %421 = vector.broadcast %420 : vector<8x1xf32> to vector<8x16xf32>
    %422 = arith.mulf %417, %421 : vector<8x16xf32>
    %423 = vector.broadcast %328 : vector<1x16xf32> to vector<8x16xf32>
    %424 = arith.mulf %422, %423 : vector<8x16xf32>
    %425 = vector.broadcast %330 : vector<1x16xf32> to vector<8x16xf32>
    %426 = arith.addf %424, %425 : vector<8x16xf32>
    %c1_193 = arith.constant 1 : index
    %c32_194 = arith.constant 32 : index
    %c0_195 = arith.constant 0 : index
    %427 = vector.load %arg1[%c1_193, %c32_194, %c0_195] : memref<2x488x128xf32, #tpu.memory_space<vmem>>, vector<1x16x48xf32>
    %428 = vector.shape_cast %427 : vector<1x16x48xf32> to vector<16x48xf32>
    %cst_196 = arith.constant dense<0.000000e+00> : vector<8x48xf32>
    %429 = tpu.matmul %426, %428, %cst_196 {dimension_numbers = #tpu.dot_dimension_numbers<[1], [0], [0], [1], [0, 0, 1, 1], [], []>} : vector<8x16xf32>, vector<16x48xf32>, vector<8x48xf32> -> vector<8x48xf32>
    %c1_197 = arith.constant 1 : index
    %c465_198 = arith.constant 465 : index
    %c0_199 = arith.constant 0 : index
    %430 = vector.load %arg1[%c1_197, %c465_198, %c0_199] : memref<2x488x128xf32, #tpu.memory_space<vmem>>, vector<1x1x48xf32>
    %431 = vector.shape_cast %430 : vector<1x1x48xf32> to vector<1x48xf32>
    %432 = vector.broadcast %431 : vector<1x48xf32> to vector<8x48xf32>
    %433 = arith.addf %429, %432 : vector<8x48xf32>
    %c1_200 = arith.constant 1 : index
    %c64_201 = arith.constant 64 : index
    %c0_202 = arith.constant 0 : index
    %434 = vector.load %arg1[%c1_200, %c64_201, %c0_202] : memref<2x488x128xf32, #tpu.memory_space<vmem>>, vector<1x16x16xf32>
    %435 = vector.shape_cast %434 : vector<1x16x16xf32> to vector<16x16xf32>
    %c1_203 = arith.constant 1 : index
    %c467_204 = arith.constant 467 : index
    %c0_205 = arith.constant 0 : index
    %436 = vector.load %arg1[%c1_203, %c467_204, %c0_205] : memref<2x488x128xf32, #tpu.memory_space<vmem>>, vector<1x1x16xf32>
    %437 = vector.shape_cast %436 : vector<1x1x16xf32> to vector<1x16xf32>
    %c1_206 = arith.constant 1 : index
    %c96_207 = arith.constant 96 : index
    %c0_208 = arith.constant 0 : index
    %438 = vector.load %arg1[%c1_206, %c96_207, %c0_208] : memref<2x488x128xf32, #tpu.memory_space<vmem>>, vector<1x16x32xf32>
    %439 = vector.shape_cast %438 : vector<1x16x32xf32> to vector<16x32xf32>
    %c1_209 = arith.constant 1 : index
    %c469_210 = arith.constant 469 : index
    %c0_211 = arith.constant 0 : index
    %440 = vector.load %arg1[%c1_209, %c469_210, %c0_211] : memref<2x488x128xf32, #tpu.memory_space<vmem>>, vector<1x1x32xf32>
    %441 = vector.shape_cast %440 : vector<1x1x32xf32> to vector<1x32xf32>
    %c1_212 = arith.constant 1 : index
    %c144_213 = arith.constant 144 : index
    %c0_214 = arith.constant 0 : index
    %442 = vector.load %arg1[%c1_212, %c144_213, %c0_214] : memref<2x488x128xf32, #tpu.memory_space<vmem>>, vector<1x32x16xf32>
    %443 = vector.shape_cast %442 : vector<1x32x16xf32> to vector<32x16xf32>
    %c1_215 = arith.constant 1 : index
    %c471_216 = arith.constant 471 : index
    %c0_217 = arith.constant 0 : index
    %444 = vector.load %arg1[%c1_215, %c471_216, %c0_217] : memref<2x488x128xf32, #tpu.memory_space<vmem>>, vector<1x1x16xf32>
    %445 = vector.shape_cast %444 : vector<1x1x16xf32> to vector<1x16xf32>
    %c1_218 = arith.constant 1 : index
    %c476_219 = arith.constant 476 : index
    %c0_220 = arith.constant 0 : index
    %446 = vector.load %arg1[%c1_218, %c476_219, %c0_220] : memref<2x488x128xf32, #tpu.memory_space<vmem>>, vector<1x1x16xf32>
    %447 = vector.shape_cast %446 : vector<1x1x16xf32> to vector<1x16xf32>
    %c1_221 = arith.constant 1 : index
    %c477_222 = arith.constant 477 : index
    %c0_223 = arith.constant 0 : index
    %448 = vector.load %arg1[%c1_221, %c477_222, %c0_223] : memref<2x488x128xf32, #tpu.memory_space<vmem>>, vector<1x1x16xf32>
    %449 = vector.shape_cast %448 : vector<1x1x16xf32> to vector<1x16xf32>
    %c1_224 = arith.constant 1 : index
    %c478_225 = arith.constant 478 : index
    %c0_226 = arith.constant 0 : index
    %450 = vector.load %arg1[%c1_224, %c478_225, %c0_226] : memref<2x488x128xf32, #tpu.memory_space<vmem>>, vector<1x1x16xf32>
    %451 = vector.shape_cast %450 : vector<1x1x16xf32> to vector<1x16xf32>
    %c1_227 = arith.constant 1 : index
    %c479_228 = arith.constant 479 : index
    %c0_229 = arith.constant 0 : index
    %452 = vector.load %arg1[%c1_227, %c479_228, %c0_229] : memref<2x488x128xf32, #tpu.memory_space<vmem>>, vector<1x1x16xf32>
    %453 = vector.shape_cast %452 : vector<1x1x16xf32> to vector<1x16xf32>
    %454 = vector.extract_strided_slice %433 {offsets = [0, 0], sizes = [8, 16], strides = [1, 1]} : vector<8x48xf32> to vector<8x16xf32>
    %455 = vector.extract_strided_slice %433 {offsets = [0, 16], sizes = [8, 16], strides = [1, 1]} : vector<8x48xf32> to vector<8x16xf32>
    %456 = vector.extract_strided_slice %433 {offsets = [0, 32], sizes = [8, 16], strides = [1, 1]} : vector<8x48xf32> to vector<8x16xf32>
    %457 = tpu.concatenate %455, %455 in 0 : vector<8x16xf32>, vector<8x16xf32> -> vector<16x16xf32>
    %458 = arith.mulf %457, %9 : vector<16x16xf32>
    %459 = tpu.concatenate %456, %456 in 0 : vector<8x16xf32>, vector<8x16xf32> -> vector<16x16xf32>
    %460 = arith.mulf %459, %9 : vector<16x16xf32>
    %cst_230 = arith.constant dense<0.000000e+00> : vector<8x16xf32>
    %461 = tpu.matmul %454, %458, %cst_230 {dimension_numbers = #tpu.dot_dimension_numbers<[1], [1], [0], [0], [0, 0, 1, 0], [], []>} : vector<8x16xf32>, vector<16x16xf32>, vector<8x16xf32> -> vector<8x16xf32>
    %cst_231 = arith.constant -1.000000e+30 : f32
    %462 = vector.broadcast %cst_231 : f32 to vector<8x16xf32>
    %463 = arith.select %12, %461, %462 : vector<8x16xi1>, vector<8x16xf32>
    %cst_232 = arith.constant dense<0xFF800000> : vector<8xf32>
    %464 = vector.multi_reduction <maximumf>, %463, %cst_232 [1] : vector<8x16xf32> to vector<8xf32>
    %465 = vector.shape_cast %464 : vector<8xf32> to vector<8x1xf32>
    %cst_233 = arith.constant -1.000000e+30 : f32
    %466 = vector.broadcast %cst_233 : f32 to vector<8x16xf32>
    %467 = arith.select %12, %466, %461 : vector<8x16xi1>, vector<8x16xf32>
    %cst_234 = arith.constant dense<0xFF800000> : vector<8xf32>
    %468 = vector.multi_reduction <maximumf>, %467, %cst_234 [1] : vector<8x16xf32> to vector<8xf32>
    %469 = vector.shape_cast %468 : vector<8xf32> to vector<8x1xf32>
    %470 = vector.shape_cast %465 : vector<8x1xf32> to vector<8x1xf32>
    %471 = vector.broadcast %470 : vector<8x1xf32> to vector<8x16xf32>
    %472 = vector.shape_cast %469 : vector<8x1xf32> to vector<8x1xf32>
    %473 = vector.broadcast %472 : vector<8x1xf32> to vector<8x16xf32>
    %474 = arith.select %12, %471, %473 : vector<8x16xi1>, vector<8x16xf32>
    %475 = arith.subf %461, %474 : vector<8x16xf32>
    %476 = math.exp %475 : vector<8x16xf32>
    %cst_235 = arith.constant 0.000000e+00 : f32
    %477 = vector.broadcast %cst_235 : f32 to vector<8x16xf32>
    %478 = arith.select %12, %476, %477 : vector<8x16xi1>, vector<8x16xf32>
    %cst_236 = arith.constant dense<0.000000e+00> : vector<8xf32>
    %479 = vector.multi_reduction <add>, %478, %cst_236 [1] : vector<8x16xf32> to vector<8xf32>
    %480 = vector.shape_cast %479 : vector<8xf32> to vector<8x1xf32>
    %cst_237 = arith.constant 0.000000e+00 : f32
    %481 = vector.broadcast %cst_237 : f32 to vector<8x16xf32>
    %482 = arith.select %12, %481, %476 : vector<8x16xi1>, vector<8x16xf32>
    %cst_238 = arith.constant dense<0.000000e+00> : vector<8xf32>
    %483 = vector.multi_reduction <add>, %482, %cst_238 [1] : vector<8x16xf32> to vector<8xf32>
    %484 = vector.shape_cast %483 : vector<8xf32> to vector<8x1xf32>
    %485 = vector.shape_cast %480 : vector<8x1xf32> to vector<8x1xf32>
    %486 = vector.broadcast %485 : vector<8x1xf32> to vector<8x16xf32>
    %487 = vector.shape_cast %484 : vector<8x1xf32> to vector<8x1xf32>
    %488 = vector.broadcast %487 : vector<8x1xf32> to vector<8x16xf32>
    %489 = arith.select %12, %486, %488 : vector<8x16xi1>, vector<8x16xf32>
    %490 = tpu.reciprocal %489 {approx = true} : vector<8x16xf32> -> vector<8x16xf32>
    %491 = arith.mulf %476, %490 : vector<8x16xf32>
    %cst_239 = arith.constant dense<0.000000e+00> : vector<8x16xf32>
    %492 = tpu.matmul %491, %460, %cst_239 {dimension_numbers = #tpu.dot_dimension_numbers<[1], [0], [0], [1], [0, 0, 1, 1], [], []>} : vector<8x16xf32>, vector<16x16xf32>, vector<8x16xf32> -> vector<8x16xf32>
    %cst_240 = arith.constant dense<0.000000e+00> : vector<8x16xf32>
    %493 = tpu.matmul %492, %435, %cst_240 {dimension_numbers = #tpu.dot_dimension_numbers<[1], [0], [0], [1], [0, 0, 1, 1], [], []>} : vector<8x16xf32>, vector<16x16xf32>, vector<8x16xf32> -> vector<8x16xf32>
    %494 = vector.broadcast %437 : vector<1x16xf32> to vector<8x16xf32>
    %495 = arith.addf %493, %494 : vector<8x16xf32>
    %496 = arith.addf %426, %495 : vector<8x16xf32>
    %cst_241 = arith.constant dense<0.000000e+00> : vector<8xf32>
    %497 = vector.multi_reduction <add>, %496, %cst_241 [1] : vector<8x16xf32> to vector<8xf32>
    %498 = vector.shape_cast %497 : vector<8xf32> to vector<8x1xf32>
    %cst_242 = arith.constant 1.600000e+01 : f32
    %499 = vector.broadcast %cst_242 : f32 to vector<8x1xf32>
    %500 = arith.divf %498, %499 : vector<8x1xf32>
    %501 = vector.broadcast %500 : vector<8x1xf32> to vector<8x16xf32>
    %502 = arith.subf %496, %501 : vector<8x16xf32>
    %503 = arith.mulf %502, %502 : vector<8x16xf32>
    %cst_243 = arith.constant dense<0.000000e+00> : vector<8xf32>
    %504 = vector.multi_reduction <add>, %503, %cst_243 [1] : vector<8x16xf32> to vector<8xf32>
    %505 = vector.shape_cast %504 : vector<8xf32> to vector<8x1xf32>
    %cst_244 = arith.constant 1.600000e+01 : f32
    %506 = vector.broadcast %cst_244 : f32 to vector<8x1xf32>
    %507 = arith.divf %505, %506 : vector<8x1xf32>
    %508 = vector.broadcast %500 : vector<8x1xf32> to vector<8x16xf32>
    %509 = arith.subf %496, %508 : vector<8x16xf32>
    %cst_245 = arith.constant 9.99999974E-6 : f32
    %510 = vector.broadcast %cst_245 : f32 to vector<8x1xf32>
    %511 = arith.addf %507, %510 : vector<8x1xf32>
    %512 = math.rsqrt %511 : vector<8x1xf32>
    %513 = vector.broadcast %512 : vector<8x1xf32> to vector<8x16xf32>
    %514 = arith.mulf %509, %513 : vector<8x16xf32>
    %515 = vector.broadcast %447 : vector<1x16xf32> to vector<8x16xf32>
    %516 = arith.mulf %514, %515 : vector<8x16xf32>
    %517 = vector.broadcast %449 : vector<1x16xf32> to vector<8x16xf32>
    %518 = arith.addf %516, %517 : vector<8x16xf32>
    %cst_246 = arith.constant dense<0.000000e+00> : vector<8x32xf32>
    %519 = tpu.matmul %518, %439, %cst_246 {dimension_numbers = #tpu.dot_dimension_numbers<[1], [0], [0], [1], [0, 0, 1, 1], [], []>} : vector<8x16xf32>, vector<16x32xf32>, vector<8x32xf32> -> vector<8x32xf32>
    %520 = vector.broadcast %441 : vector<1x32xf32> to vector<8x32xf32>
    %521 = arith.addf %519, %520 : vector<8x32xf32>
    %cst_247 = arith.constant 0.000000e+00 : f32
    %522 = vector.broadcast %cst_247 : f32 to vector<8x32xf32>
    %523 = arith.maximumf %521, %522 : vector<8x32xf32>
    %cst_248 = arith.constant dense<0.000000e+00> : vector<8x16xf32>
    %524 = tpu.matmul %523, %443, %cst_248 {dimension_numbers = #tpu.dot_dimension_numbers<[1], [0], [0], [1], [0, 0, 1, 1], [], []>} : vector<8x32xf32>, vector<32x16xf32>, vector<8x16xf32> -> vector<8x16xf32>
    %525 = vector.broadcast %445 : vector<1x16xf32> to vector<8x16xf32>
    %526 = arith.addf %524, %525 : vector<8x16xf32>
    %527 = arith.addf %518, %526 : vector<8x16xf32>
    %cst_249 = arith.constant dense<0.000000e+00> : vector<8xf32>
    %528 = vector.multi_reduction <add>, %527, %cst_249 [1] : vector<8x16xf32> to vector<8xf32>
    %529 = vector.shape_cast %528 : vector<8xf32> to vector<8x1xf32>
    %cst_250 = arith.constant 1.600000e+01 : f32
    %530 = vector.broadcast %cst_250 : f32 to vector<8x1xf32>
    %531 = arith.divf %529, %530 : vector<8x1xf32>
    %532 = vector.broadcast %531 : vector<8x1xf32> to vector<8x16xf32>
    %533 = arith.subf %527, %532 : vector<8x16xf32>
    %534 = arith.mulf %533, %533 : vector<8x16xf32>
    %cst_251 = arith.constant dense<0.000000e+00> : vector<8xf32>
    %535 = vector.multi_reduction <add>, %534, %cst_251 [1] : vector<8x16xf32> to vector<8xf32>
    %536 = vector.shape_cast %535 : vector<8xf32> to vector<8x1xf32>
    %cst_252 = arith.constant 1.600000e+01 : f32
    %537 = vector.broadcast %cst_252 : f32 to vector<8x1xf32>
    %538 = arith.divf %536, %537 : vector<8x1xf32>
    %539 = vector.broadcast %531 : vector<8x1xf32> to vector<8x16xf32>
    %540 = arith.subf %527, %539 : vector<8x16xf32>
    %cst_253 = arith.constant 9.99999974E-6 : f32
    %541 = vector.broadcast %cst_253 : f32 to vector<8x1xf32>
    %542 = arith.addf %538, %541 : vector<8x1xf32>
    %543 = math.rsqrt %542 : vector<8x1xf32>
    %544 = vector.broadcast %543 : vector<8x1xf32> to vector<8x16xf32>
    %545 = arith.mulf %540, %544 : vector<8x16xf32>
    %546 = vector.broadcast %451 : vector<1x16xf32> to vector<8x16xf32>
    %547 = arith.mulf %545, %546 : vector<8x16xf32>
    %548 = vector.broadcast %453 : vector<1x16xf32> to vector<8x16xf32>
    %549 = arith.addf %547, %548 : vector<8x16xf32>
    %cst_254 = arith.constant 0.000000e+00 : f32
    %550 = vector.broadcast %cst_254 : f32 to vector<8x112xf32>
    %551 = tpu.concatenate %549, %550 in 1 : vector<8x16xf32>, vector<8x112xf32> -> vector<8x128xf32>
    %c1_255 = arith.constant 1 : index
    %c0_256 = arith.constant 0 : index
    %c0_257 = arith.constant 0 : index
    %552 = vector.load %arg2[%c1_255, %c0_256, %c0_257] : memref<2x8x128xf32, #tpu.memory_space<vmem>>, vector<1x8x128xf32>
    %553 = vector.shape_cast %552 : vector<1x8x128xf32> to vector<8x128xf32>
    %554 = vector.shape_cast %551 : vector<8x128xf32> to vector<1x8x128xf32>
    tpu.vector_store %arg2[%c1_255, %c0_256, %c0_257], %554 {strides = array<i32>} : memref<2x8x128xf32, #tpu.memory_space<vmem>>, vector<1x8x128xf32>,
    %c1_258 = arith.constant 1 : index
    %c176_259 = arith.constant 176 : index
    %c0_260 = arith.constant 0 : index
    %555 = vector.load %arg1[%c1_258, %c176_259, %c0_260] : memref<2x488x128xf32, #tpu.memory_space<vmem>>, vector<1x16x128xf32>
    %556 = vector.shape_cast %555 : vector<1x16x128xf32> to vector<16x128xf32>
    %cst_261 = arith.constant dense<0.000000e+00> : vector<8x128xf32>
    %557 = tpu.matmul %549, %556, %cst_261 {dimension_numbers = #tpu.dot_dimension_numbers<[1], [0], [0], [1], [0, 0, 1, 1], [], []>} : vector<8x16xf32>, vector<16x128xf32>, vector<8x128xf32> -> vector<8x128xf32>
    %c1_262 = arith.constant 1 : index
    %c480_263 = arith.constant 480 : index
    %c0_264 = arith.constant 0 : index
    %558 = vector.load %arg1[%c1_262, %c480_263, %c0_264] : memref<2x488x128xf32, #tpu.memory_space<vmem>>, vector<1x1x128xf32>
    %559 = vector.shape_cast %558 : vector<1x1x128xf32> to vector<1x128xf32>
    %560 = vector.broadcast %559 : vector<1x128xf32> to vector<8x128xf32>
    %561 = arith.addf %557, %560 : vector<8x128xf32>
    %cst_265 = arith.constant 0.000000e+00 : f32
    %562 = vector.broadcast %cst_265 : f32 to vector<8x128xf32>
    %563 = arith.maximumf %561, %562 : vector<8x128xf32>
    %c1_266 = arith.constant 1 : index
    %c192_267 = arith.constant 192 : index
    %c0_268 = arith.constant 0 : index
    %564 = vector.load %arg1[%c1_266, %c192_267, %c0_268] : memref<2x488x128xf32, #tpu.memory_space<vmem>>, vector<1x16x128xf32>
    %565 = vector.shape_cast %564 : vector<1x16x128xf32> to vector<16x128xf32>
    %cst_269 = arith.constant dense<0.000000e+00> : vector<8x128xf32>
    %566 = tpu.matmul %549, %565, %cst_269 {dimension_numbers = #tpu.dot_dimension_numbers<[1], [0], [0], [1], [0, 0, 1, 1], [], []>} : vector<8x16xf32>, vector<16x128xf32>, vector<8x128xf32> -> vector<8x128xf32>
    %c1_270 = arith.constant 1 : index
    %c481_271 = arith.constant 481 : index
    %c0_272 = arith.constant 0 : index
    %567 = vector.load %arg1[%c1_270, %c481_271, %c0_272] : memref<2x488x128xf32, #tpu.memory_space<vmem>>, vector<1x1x128xf32>
    %568 = vector.shape_cast %567 : vector<1x1x128xf32> to vector<1x128xf32>
    %569 = vector.broadcast %568 : vector<1x128xf32> to vector<8x128xf32>
    %570 = arith.addf %566, %569 : vector<8x128xf32>
    %cst_273 = arith.constant 0.000000e+00 : f32
    %571 = vector.broadcast %cst_273 : f32 to vector<8x128xf32>
    %572 = arith.maximumf %570, %571 : vector<8x128xf32>
    %c1_274 = arith.constant 1 : index
    %c208_275 = arith.constant 208 : index
    %c0_276 = arith.constant 0 : index
    %573 = vector.load %arg1[%c1_274, %c208_275, %c0_276] : memref<2x488x128xf32, #tpu.memory_space<vmem>>, vector<1x128x128xf32>
    %574 = vector.shape_cast %573 : vector<1x128x128xf32> to vector<128x128xf32>
    %cst_277 = arith.constant dense<0.000000e+00> : vector<8x128xf32>
    %575 = tpu.matmul %563, %574, %cst_277 {dimension_numbers = #tpu.dot_dimension_numbers<[1], [0], [0], [1], [0, 0, 1, 1], [], []>} : vector<8x128xf32>, vector<128x128xf32>, vector<8x128xf32> -> vector<8x128xf32>
    %c1_278 = arith.constant 1 : index
    %c336_279 = arith.constant 336 : index
    %c0_280 = arith.constant 0 : index
    %576 = vector.load %arg1[%c1_278, %c336_279, %c0_280] : memref<2x488x128xf32, #tpu.memory_space<vmem>>, vector<1x128x128xf32>
    %577 = vector.shape_cast %576 : vector<1x128x128xf32> to vector<128x128xf32>
    %cst_281 = arith.constant dense<0.000000e+00> : vector<8x128xf32>
    %578 = tpu.matmul %572, %577, %cst_281 {dimension_numbers = #tpu.dot_dimension_numbers<[1], [0], [0], [1], [0, 0, 1, 1], [], []>} : vector<8x128xf32>, vector<128x128xf32>, vector<8x128xf32> -> vector<8x128xf32>
    %579 = arith.addf %575, %578 : vector<8x128xf32>
    %c1_282 = arith.constant 1 : index
    %c482_283 = arith.constant 482 : index
    %c0_284 = arith.constant 0 : index
    %580 = vector.load %arg1[%c1_282, %c482_283, %c0_284] : memref<2x488x128xf32, #tpu.memory_space<vmem>>, vector<1x1x128xf32>
    %581 = vector.shape_cast %580 : vector<1x1x128xf32> to vector<1x128xf32>
    %582 = vector.broadcast %581 : vector<1x128xf32> to vector<8x128xf32>
    %583 = arith.addf %579, %582 : vector<8x128xf32>
    %c1_285 = arith.constant 1 : index
    %c0_286 = arith.constant 0 : index
    %c0_287 = arith.constant 0 : index
    %584 = vector.load %arg3[%c1_285, %c0_286, %c0_287] : memref<2x8x128xf32, #tpu.memory_space<vmem>>, vector<1x8x128xf32>
    %585 = vector.shape_cast %584 : vector<1x8x128xf32> to vector<8x128xf32>
    %586 = vector.shape_cast %583 : vector<8x128xf32> to vector<1x8x128xf32>
    tpu.vector_store %arg3[%c1_285, %c0_286, %c0_287], %586 {strides = array<i32>} : memref<2x8x128xf32, #tpu.memory_space<vmem>>, vector<1x8x128xf32>,
    return
  }
}

</mosaic_0001>

<bundles_post_ra>
// kernel: tpu_custom_call.1
= control target key start
LH: loop header
LB: loop body
LE: loop exit
PB: predicated region body
PF: predicated region fallthrough
CT: control target
= control target key end

     0   :  { %9 = vsyncpa [#allocation3], 0  ;;  %s4509_s0 = inlined_call_operand.hbm [shape: f32[2,8,32], index: 0, kind: input, shape index: {}]   ;;  %s4510_s1 = inlined_call_operand.hbm [shape: f32[2,488,128], index: 1, kind: input, shape index: {}]   ;;  %s4511_s2 = inlined_call_operand.hbm [shape: f32[2,8,128], index: 2, kind: output, shape index: {0}]   ;;  %s4512_s3 = inlined_call_operand.hbm [shape: f32[2,8,128], index: 3, kind: output, shape index: {1}]  }
   0x1   :  { %10 = vsyncpa [#allocation6], 0 }
   0x2   :  { %11 = vsyncpa [#allocation4], 0 }
   0x3   :  { %12 = vsyncpa [#allocation9], 0  ;;  %s4075_s12 = smov [#allocation2]   ;;  %s3979_s16 = scalar_lea.hbm %s4509_s0, 256 }
   0x4   :  { %s18_s13 = sshll.u32 %s4075_s12, 4  ;;  %p3980_p0 = scmp.ne.s32.totalorder %s4509_s0, %s3979_s16  ;;  %s19_s13 = int_to_ptr.vmem [resolvable:$true] %s18_s13 }
   0x5   :  { %p3983_p1 = scmp.lt.u32.totalorder %s3979_s16, %s4509_s0 }
   0x7   :  { %p3985_p2 = pnand %p3983_p1, %p3980_p0 }
   0x9   :  { %3988 = shalt.err (!%p3985_p2)
}
   0xa   :  { %s3989_s21 = scalar_lea.vmem %s19_s13, 256  ;;  %p3994_p4 = scmp.lt.s32.totalorder %s19_s13, %s19_s13 }
   0xb   :  { %p3990_p3 = scmp.ne.s32.totalorder %s19_s13, %s3989_s21  ;;  %p3995_p5 = scmp.lt.s32.totalorder %s3989_s21, %s3989_s21 }
   0xd   :  { %p3996_p6 = por %p3995_p5, %p3994_p4 }
   0xf   :  { %p3997_p7 = pnand %p3996_p6, %p3990_p3 }
  0x11   :  { %4000 = shalt.err (!%p3997_p7)
}
  0x12   :  { %s4076_s22 = smov 128   ;;  %s4077_s23 = smov 8  }
  0x13   :  { %24 = dma.hbm_to_vmem [thread:$0]  %s4509_s0, 256, %s19_s13, [#allocation3], %s4076_s22, %s4076_s22, %s4077_s23  }
  0x14   :  { %s4078_s26 = smov [#allocation5]   ;;  %s4001_s30 = scalar_lea.hbm %s4510_s1, 15616 }
  0x15   :  { %s30_s27 = sshll.u32 %s4078_s26, 4  ;;  %p4002_p8 = scmp.ne.s32.totalorder %s4510_s1, %s4001_s30  ;;  %s31_s27 = int_to_ptr.vmem [resolvable:$true] %s30_s27 }
  0x16   :  { %p4005_p9 = scmp.lt.u32.totalorder %s4001_s30, %s4510_s1 }
  0x18   :  { %p4007_p10 = pnand %p4005_p9, %p4002_p8 }
  0x1a   :  { %4010 = shalt.err (!%p4007_p10)
}
  0x1b   :  { %s4011_s8 = scalar_lea.vmem %s31_s27, 15616  ;;  %p4016_p12 = scmp.lt.s32.totalorder %s31_s27, %s31_s27 }
  0x1c   :  { %p4012_p11 = scmp.ne.s32.totalorder %s31_s27, %s4011_s8  ;;  %p4017_p13 = scmp.lt.s32.totalorder %s4011_s8, %s4011_s8 }
  0x1e   :  { %p4018_p0 = por %p4017_p13, %p4016_p12 }
  0x20   :  { %p4019_p1 = pnand %p4018_p0, %p4012_p11 }
  0x22   :  { %4022 = shalt.err (!%p4019_p1)
}
  0x23   :  { %36 = dma.hbm_to_vmem [thread:$0]  %s4510_s1, 15616, %s31_s27, [#allocation6], %s4076_s22, %s4076_s22, %s4077_s23  }
  0x24   :  { %4067 = dma.done.wait [#allocation3], 256  }
  0x25   :  { %4068 = vsyncadd [#allocation3], 4294967040 }
  0x26   :  { %4069 = dma.done.wait [#allocation6], 15616  }
  0x27   :  { %4070 = vsyncadd [#allocation6], 4294951680  ;;  %v4079_v0 = vmov 0.0|0.0   ;;  %vm4080_vm0 = vmmov 0   ;;  %v4081_v1 = vmov 0.0   ;;  %v46_v2 = vlaneseq  ;;  %v60_v4 = vld [vmem:[#allocation5] sm:$0xff] }
  0x28   :  { %3674 = vmatprep.subr.bf16.mxu0 %v4079_v0  ;;  %3322 = vmatprep.mubr.msk.f32.mxu0 %vm4080_vm0, %v4081_v1  ;;  %vm4082_vm2 = vmmov 1   ;;  %v61_v5 = vld [vmem:[#allocation5 + $0x8] sm:$0xff]  ;;  %v62_v6 = vld [vmem:[#allocation5 + $0x10] sm:$0xff]  ;;  %v63_v8 = vld [vmem:[#allocation5 + $0x18] sm:$0xff]  ;;  %s4083_s1 = smov 32   ;;  %vm69_vm6 = vcmask 261120  }
  0x29   :  { %3680 = vmatprep.subr.bf16.mxu1 %v4079_v0  ;;  %3329 = vmatprep.mubr.msk.f32.mxu1 %vm4080_vm0, %v4081_v1  ;;  %v4147_v3 = vand.u32 127, %v46_v2  ;;  %v3675_v7 = vpack.c.bf16 %v61_v5, %v60_v4  ;;  %v3678_v10 = vpack.c.bf16 %v63_v8, %v62_v6  ;;  %v59_v13 = vld [vmem:[#allocation2] sm:$0xff]  ;;  %s4084_s10 = smov 112   ;;  %s4085_s11 = smov 96   ;;  %vm185_vm7 = vcmask 130048   ;;  %v144_v53 = vld [vmem:[#allocation5 + $0x38] sm:$0xff] }
  0x2a   :  { %v3076_v15 = vld [vmem:[#allocation5 + $0x1d0] ss:$0 sm:$0xff]  ;;  %vm4179_vm8 = vmpackc.low %vm185_vm7, %vm185_vm7  ;;  %s4086_s12 = smov 48   ;;  %s4087_s13 = smov 80   ;;  %v3082_v5 = vld [vmem:[#allocation5 + $0x1d2] ss:$0 sm:$0xff] }
  0x2b   :  { %vm50_vm1 = vcmp.lt.s32.totalorder %v4147_v3, 8  ;;  %3676 = vmatpush3.bf16.msra.mxu0 %v3675_v7  ;;  %v143_v52 = vld [vmem:[#allocation5 + $0x30] sm:$0xff]  ;;  %s4088_s14 = smov 16   ;;  %s4089_s15 = smov [#allocation7]  }
  0x2c   :  { %vm51_vm3 = vmxor %vm4082_vm2, %vm50_vm1  ;;  %3677 = vmatprep.subr.bf16.mxu0 %v4079_v0  ;;  %v3688_v54 = vpack.c.bf16 %v144_v53, %v143_v52  ;;  %s3045_s16 = sshll.u32 %s4089_s15, 4  ;;  %s3046_s16 = int_to_ptr.vmem [resolvable:$true] %s3045_s16 }
  0x2d   :  { %vm53_vm4 = vmxor %vm51_vm3, %vm4082_vm2  ;;  %s4023_s17 = scalar_lea.vmem %s3046_s16, 256  ;;  %p4028_p3 = scmp.lt.s32.totalorder %s3046_s16, %s3046_s16 }
  0x2e   :  { %vm54_vm5 = vmxor %vm50_vm1, %vm4082_vm2  ;;  %v3074_v9 = vsel %vm53_vm4, 1.0, %v4081_v1  ;;  %p4024_p2 = scmp.ne.s32.totalorder %s3046_s16, %s4023_s17  ;;  %p4029_p4 = scmp.lt.s32.totalorder %s4023_s17, %s4023_s17 }
  0x2f   :  { %v3075_v11 = vsel %vm54_vm5, 1.0, %v4081_v1  ;;  %3679 = vmatpush3.bf16.msra.mxu0 %v3678_v10 }
  0x30   :  { %v4157_v12 = vpack.i.bf16 %v3075_v11, %v3074_v9  ;;  %3684 = vmatprep.subr.bf16.mxu0 %v4079_v0  ;;  %p4030_p5 = por %p4029_p4, %p4028_p3 }
  0x32   :  { %3893 = vrot.lane.b32.xlu0 %v4157_v12, %s4083_s1  ;;  %3323 = vmatmul.mubr.msk.f32.vlgmr.msra.gmra.mrb[0].mxu0 %vm69_vm6, %v59_v13  ;;  %p4031_p6 = pnand %p4030_p5, %p4024_p2 }
  0x33   :  { %3336 = vmatprep.mubr.msk.f32.mxu0 %vm4080_vm0, %v4081_v1 }
  0xa4   :  { %v3894_v14 = vpop.permute.xlu0 %3893 }
  0xa5   :  { %v4164_v16 = vunpack.i.h.bf16 %v3894_v14  ;;  %v4166_v17 = vunpack.i.l.bf16 %v3894_v14 }
 0x105   :  { %v139_v18 = vpop.f32.mrb[0].mxu0 }
 0x106   :  { %v4168_v19 = vadd.f32 %v3076_v15, %v139_v18  ;;  %v3324_v20 = vpop.f32.mrb[1].mxu0 }
 0x107   :  { %v146_v20 = vld [vmem:[#allocation5 + $0x50] sm:$0xff] }
 0x108   :  { %177 = vrot.lane.b32.xlu1 %v4168_v19, %s4084_s10  ;;  %v166_v21 = vmul.f32 %v4166_v17, %v4168_v19  ;;  %v167_v22 = vmul.f32 %v4164_v16, %v4168_v19 }
 0x10a   :  { %v3897_v23 = vpack.i.bf16 %v167_v22, %v166_v21  ;;  %v147_v21 = vld [vmem:[#allocation5 + $0x58] sm:$0xff] }
 0x10b   :  { %v3691_v22 = vpack.c.bf16 %v147_v21, %v146_v20 }
 0x10c   :  { %3898 = vrot.lane.b32.xlu0 %v3897_v23, %s4085_s11  ;;  %v149_v23 = vld [vmem:[#allocation5 + $0x70] sm:$0xff] }
 0x17a   :  { %v178_v29 = vpop.permute.xlu1 %177 }
 0x17e   :  { %v3899_v24 = vpop.permute.xlu0 %3898 }
 0x17f   :  { %v3901_v25 = vunpack.i.h.bf16 %v3899_v24  ;;  %v3900_v26 = vunpack.i.l.bf16 %v3899_v24  ;;  %v150_v24 = vld [vmem:[#allocation5 + $0x78] sm:$0xff] }
 0x181   :  { %v3681_v28 = vpack.c.bf16 %v3901_v25, %v3900_v26  ;;  %v3694_v25 = vpack.c.bf16 %v150_v24, %v149_v23 }
 0x183   :  { %3683 = vmatpush3.bf16.xpose.msk.msra.mxu1 %vm4179_vm8, %v3681_v28 }
 0x184   :  { %3687 = vmatprep.subr.bf16.mxu1 %v4079_v0 }
 0x18a   :  { %3330 = vmatmul.mubr.msk.f32.vlgmr.msra.gmra.mrb[0].mxu1 %vm185_vm7, %v178_v29 }
 0x18b   :  { %3343 = vmatprep.mubr.msk.f32.mxu1 %vm4080_vm0, %v4081_v1  ;;  %3689 = vmatpush3.bf16.msra.mxu1 %v3688_v54 }
 0x18c   :  { %3693 = vmatprep.subr.bf16.mxu1 %v4079_v0 }
 0x25d   :  { %v258_v30 = vpop.f32.mrb[0].mxu1 }
 0x25e   :  { %v3331_v31 = vpop.f32.mrb[1].mxu1  ;;  %v266_v32 = vsel %vm50_vm1, -1e+30, %v258_v30  ;;  %v262_v33 = vsel %vm50_vm1, %v258_v30, -1e+30 }
 0x25f   :  { %v267_v34 = vsel %vm185_vm7, %v266_v32, -inf  ;;  %v263_v35 = vsel %vm185_vm7, %v262_v33, -inf  ;;  %v3085_v32 = vld [vmem:[#allocation5 + $0x1d9] ss:$0 sm:$0xff] }
 0x260   :  { %268 = vmax.xlane.f32.xlu0 %v267_v34  ;;  %264 = vmax.xlane.f32.xlu1 %v263_v35  ;;  %v151_v35 = vld [vmem:[#allocation5 + $0x80] sm:$0xff] }
 0x276   :  { %3903 = vrot.lane.b32.xlu0 %v4157_v12, %s4086_s12 }
 0x2ed   :  { %v269_v36 = vpop.xlane.xlu0 %268  ;;  %v265_v37 = vpop.xlane.xlu1 %264 }
 0x2ee   :  { %v270_v38 = vsel %vm50_vm1, %v265_v37, %v269_v36  ;;  %v152_v36 = vld [vmem:[#allocation5 + $0x88] sm:$0xff] }
 0x2ef   :  { %v271_v39 = vsub.f32 %v258_v30, %v270_v38  ;;  %v3084_v30 = vld [vmem:[#allocation5 + $0x1d8] ss:$0 sm:$0xff]  ;;  %v3697_v37 = vpack.c.bf16 %v152_v36, %v151_v35  ;;  %v3086_v38 = vld [vmem:[#allocation5 + $0x1d4] ss:$0 sm:$0xff] }
 0x2f1   :  { %v272_v40 = vmul.f32 1.442695, %v271_v39  ;;  %v4204_v46 = vpop.permute.xlu0 %3903 }
 0x2f2   :  { %v3906_v47 = vunpack.i.h.bf16 %v4204_v46  ;;  %v3905_v48 = vunpack.i.l.bf16 %v4204_v46 }
 0x2f3   :  { %3947 = vpow2.f32 %v272_v40 }
 0x2f4   :  { %v175_v49 = vmul.f32 %v3906_v47, %v4168_v19  ;;  %v174_v50 = vmul.f32 %v3905_v48, %v4168_v19 }
 0x2f6   :  { %v3907_v51 = vpack.i.bf16 %v175_v49, %v174_v50 }
 0x2fd   :  { %v3948_v41 = vpop.eup %3947 }
 0x2fe   :  { %v274_v42 = vsel %vm50_vm1, %v3948_v41, 0.0  ;;  %v278_v44 = vsel %vm50_vm1, 0.0, %v3948_v41 }
 0x2ff   :  { %v275_v43 = vsel %vm185_vm7, %v274_v42, 0.0  ;;  %v279_v45 = vsel %vm185_vm7, %v278_v44, 0.0 }
 0x300   :  { %276 = vadd.xlane.f32.xlu1 %v275_v43  ;;  %v3088_v43 = vld [vmem:[#allocation5 + $0x1d6] ss:$0 sm:$0xff] }
 0x304   :  { %280 = vadd.xlane.f32.xlu1 %v279_v45 }
 0x315   :  { %3908 = vrot.lane.b32.xlu1 %v3907_v51, %s4087_s13 }
 0x38d   :  { %v277_v55 = vpop.xlane.xlu1 %276 }
 0x391   :  { %v281_v56 = vpop.xlane.xlu1 %280 }
 0x392   :  { %v282_v57 = vsel %vm50_vm1, %v277_v55, %v281_v56 }
 0x393   :  { %3949 = vrcp.f32 %v282_v57  ;;  %v647_v57 = vld [vmem:[#allocation5 + $0x20] sm:$0xff] }
 0x395   :  { %v3909_v58 = vpop.permute.xlu1 %3908 }
 0x396   :  { %v3911_v59 = vunpack.i.h.bf16 %v3909_v58  ;;  %v3910_v60 = vunpack.i.l.bf16 %v3909_v58  ;;  %v648_v58 = vld [vmem:[#allocation5 + $0x28] sm:$0xff] }
 0x398   :  { %v3685_v61 = vpack.c.bf16 %v3911_v59, %v3910_v60  ;;  %v3700_v59 = vpack.c.bf16 %v648_v58, %v647_v57 }
 0x39a   :  { %3686 = vmatpush3.bf16.msra.mxu0 %v3685_v61 }
 0x39b   :  { %3690 = vmatprep.subr.bf16.mxu0 %v4079_v0 }
 0x39d   :  { %v3950_v62 = vpop.eup %3949 }
 0x39e   :  { %v284_v63 = vmul.f32 %v3950_v62, %v3948_v41 }
 0x3a0   :  { %3337 = vmatmul.mubr.msk.f32.vlgmr.msra.gmra.mrb[2].mxu0 %vm185_vm7, %v284_v63 }
 0x3a1   :  { %3350 = vmatprep.mubr.msk.f32.mxu0 %vm4080_vm0, %v4081_v1  ;;  %3692 = vmatpush3.bf16.msra.mxu0 %v3691_v22 }
 0x3a2   :  { %3699 = vmatprep.subr.bf16.mxu0 %v4079_v0 }
 0x473   :  { %v362_v2 = vpop.f32.mrb[2].mxu0 }
 0x474   :  { %v3338_v4 = vpop.f32.mrb[3].mxu0  ;;  %3344 = vmatmul.mubr.msk.f32.vlgmr.msra.gmra.mrb[2].mxu1 %vm185_vm7, %v362_v2  ;;  %v3090_v2 = vld [vmem:[#allocation5 + $0x1da] ss:$0 sm:$0xff] }
 0x475   :  { %3361 = vmatprep.mubr.msk.f32.mxu1 %vm4080_vm0, %v4081_v1  ;;  %3695 = vmatpush3.bf16.msra.mxu1 %v3694_v25 }
 0x476   :  { %3696 = vmatprep.subr.bf16.mxu1 %v4079_v0 }
 0x479   :  { %3698 = vmatpush3.bf16.msra.mxu1 %v3697_v37 }
 0x47a   :  { %3706 = vmatprep.subr.bf16.mxu1 %v4079_v0 }
 0x547   :  { %v439_v6 = vpop.f32.mrb[2].mxu1 }
 0x548   :  { %v440_v7 = vadd.f32 %v3082_v5, %v439_v6  ;;  %v3345_v8 = vpop.f32.mrb[3].mxu1  ;;  %v3091_v5 = vld [vmem:[#allocation5 + $0x1db] ss:$0 sm:$0xff] }
 0x54a   :  { %v443_v9 = vadd.f32 %v440_v7, %v4168_v19 }
 0x54c   :  { %v444_v10 = vsel %vm185_vm7, %v443_v9, 0.0 }
 0x54d   :  { %445 = vadd.xlane.f32.xlu0 %v444_v10 }
 0x5da   :  { %v446_v11 = vpop.xlane.xlu0 %445 }
 0x5db   :  { %v448_v13 = vmul.f32 0.0625, %v446_v11 }
 0x5dd   :  { %v449_v14 = vsub.f32 %v443_v9, %v448_v13 }
 0x5df   :  { %v450_v15 = vmul.f32 %v449_v14, %v449_v14 }
 0x5e1   :  { %v451_v18 = vsel %vm185_vm7, %v450_v15, 0.0 }
 0x5e2   :  { %452 = vadd.xlane.f32.xlu1 %v451_v18 }
 0x66f   :  { %v453_v19 = vpop.xlane.xlu1 %452 }
 0x670   :  { %v454_v26 = vmul.f32 0.0625, %v453_v19 }
 0x672   :  { %v455_v28 = vadd.f32 1e-05, %v454_v26 }
 0x674   :  { %3951 = vrsqrt.f32 %v455_v28 }
 0x67e   :  { %v3952_v29 = vpop.eup %3951 }
 0x67f   :  { %v457_v31 = vmul.f32 %v3952_v29, %v449_v14 }
 0x681   :  { %v462_v33 = vmul.f32 %v3084_v30, %v457_v31 }
 0x683   :  { %v467_v34 = vadd.f32 %v3085_v32, %v462_v33 }
 0x685   :  { %3351 = vmatmul.mubr.msk.f32.vlgmr.msra.gmra.mrb[4].mxu0 %vm185_vm7, %v467_v34 }
 0x686   :  { %3368 = vmatprep.mubr.msk.f32.mxu0 %vm4080_vm0, %v4081_v1  ;;  %3701 = vmatpush3.bf16.msra.mxu0 %v3700_v59 }
 0x687   :  { %3702 = vmatprep.subr.bf16.mxu0 %v4079_v0 }
 0x758   :  { %v541_v39 = vpop.f32.mrb[4].mxu0 }
 0x759   :  { %v542_v40 = vadd.f32 %v3086_v38, %v541_v39  ;;  %v3352_v41 = vpop.f32.mrb[5].mxu0 }
 0x75b   :  { %v545_v42 = vmax.f32 %v542_v40, 0.0 }
 0x75d   :  { %3362 = vmatmul.mubr.msk.f32.vlgmr.msra.gmra.mrb[4].mxu1 %vm69_vm6, %v545_v42 }
 0x75e   :  { %3382 = vmatprep.mubr.msk.f32.mxu1 %vm4080_vm0, %v4081_v1 }
 0x830   :  { %v619_v44 = vpop.f32.mrb[4].mxu1 }
 0x831   :  { %v620_v45 = vadd.f32 %v3088_v43, %v619_v44  ;;  %v3363_v49 = vpop.f32.mrb[5].mxu1 }
 0x833   :  { %v623_v50 = vadd.f32 %v620_v45, %v467_v34 }
 0x835   :  { %v624_v51 = vsel %vm185_vm7, %v623_v50, 0.0 }
 0x836   :  { %625 = vadd.xlane.f32.xlu0 %v624_v51 }
 0x8c3   :  { %v626_v52 = vpop.xlane.xlu0 %625 }
 0x8c4   :  { %v627_v53 = vmul.f32 0.0625, %v626_v52 }
 0x8c6   :  { %v628_v54 = vsub.f32 %v623_v50, %v627_v53 }
 0x8c8   :  { %v629_v55 = vmul.f32 %v628_v54, %v628_v54 }
 0x8ca   :  { %v630_v56 = vsel %vm185_vm7, %v629_v55, 0.0  ;;  %v728_v55 = vld [vmem:[#allocation5 + $0x48] sm:$0xff] }
 0x8cb   :  { %631 = vadd.xlane.f32.xlu0 %v630_v56 }
 0x8e1   :  { %3913 = vrot.lane.b32.xlu0 %v4157_v12, %s4088_s14  ;;  %v3092_v12 = vld [vmem:[#allocation5 + $0x1d1] ss:$0 sm:$0xff] }
 0x958   :  { %v632_v60 = vpop.xlane.xlu0 %631 }
 0x959   :  { %v633_v61 = vmul.f32 0.0625, %v632_v60 }
 0x95b   :  { %v634_v62 = vadd.f32 1e-05, %v633_v61  ;;  %v3098_v61 = vld [vmem:[#allocation5 + $0x1d3] ss:$0 sm:$0xff] }
 0x95c   :  { %v4247_v8 = vpop.permute.xlu0 %3913 }
 0x95d   :  { %3953 = vrsqrt.f32 %v634_v62  ;;  %v3916_v9 = vunpack.i.h.bf16 %v4247_v8  ;;  %v3915_v10 = vunpack.i.l.bf16 %v4247_v8 }
 0x967   :  { %v3954_v63 = vpop.eup %3953 }
 0x968   :  { %v636_v4 = vmul.f32 %v3954_v63, %v628_v54  ;;  %v727_v54 = vld [vmem:[#allocation5 + $0x40] sm:$0xff] }
 0x969   :  { %v3710_v57 = vpack.c.bf16 %v728_v55, %v727_v54  ;;  %v1221_v54 = vld [vmem:[#allocation5 + $0xb0] sm:$0xff]  ;;  %v1222_v55 = vld [vmem:[#allocation5 + $0xb8] sm:$0xff] }
 0x96a   :  { %v641_v6 = vmul.f32 %v3090_v2, %v636_v4 }
 0x96c   :  { %v4241_v7 = vadd.f32 %v3091_v5, %v641_v6 }
 0x96e   :  { %3369 = vmatmul.mubr.msk.f32.vlgmr.msra.gmra.mrb[6].mxu0 %vm185_vm7, %v4241_v7 }
 0x96f   :  { %3375 = vmatprep.mubr.msk.f32.mxu0 %vm4080_vm0, %v4081_v1 }
 0xa41   :  { %v723_v11 = vpop.f32.mrb[6].mxu0 }
 0xa42   :  { %v724_v13 = vadd.f32 %v3092_v12, %v723_v11  ;;  %v3370_v14 = vpop.f32.mrb[7].mxu0 }
 0xa44   :  { %v748_v15 = vmul.f32 %v3915_v10, %v724_v13  ;;  %v749_v18 = vmul.f32 %v3916_v9, %v724_v13  ;;  %v750_v41 = vmul.f32 %v4166_v17, %v724_v13  ;;  %v751_v42 = vmul.f32 %v4164_v16, %v724_v13 }
 0xa46   :  { %v3917_v20 = vpack.i.bf16 %v749_v18, %v748_v15  ;;  %v3922_v43 = vpack.i.bf16 %v751_v42, %v750_v41  ;;  %v730_v15 = vld [vmem:[#allocation5 + $0x60] sm:$0xff]  ;;  %v731_v18 = vld [vmem:[#allocation5 + $0x68] sm:$0xff] }
 0xa48   :  { %3918 = vrot.lane.b32.xlu1 %v3917_v20, %s4084_s10  ;;  %v3713_v20 = vpack.c.bf16 %v731_v18, %v730_v15  ;;  %v1406_v15 = vld [vmem:[#allocation5 + $0x1a0] sm:$0xff]  ;;  %v1407_v18 = vld [vmem:[#allocation5 + $0x1a8] sm:$0xff] }
 0xaba   :  { %v3919_v21 = vpop.permute.xlu1 %3918 }
 0xabb   :  { %v3921_v22 = vunpack.i.h.bf16 %v3919_v21  ;;  %v3920_v23 = vunpack.i.l.bf16 %v3919_v21  ;;  %v733_v21 = vld [vmem:[#allocation5 + $0x90] sm:$0xff] }
 0xabd   :  { %v3703_v24 = vpack.c.bf16 %v3921_v22, %v3920_v23  ;;  %v734_v22 = vld [vmem:[#allocation5 + $0x98] sm:$0xff] }
 0xabe   :  { %v3716_v23 = vpack.c.bf16 %v734_v22, %v733_v21 }
 0xabf   :  { %3705 = vmatpush3.bf16.xpose.msk.msra.mxu0 %vm4179_vm8, %v3703_v24 }
 0xac0   :  { %3712 = vmatprep.subr.bf16.mxu0 %v4079_v0 }
 0xac6   :  { %3376 = vmatmul.mubr.msk.f32.vlgmr.msra.gmra.mrb[8].mxu0 %vm185_vm7, %v724_v13 }
 0xac7   :  { %3396 = vmatprep.mubr.msk.f32.mxu0 %vm4080_vm0, %v4081_v1  ;;  %3714 = vmatpush3.bf16.msra.mxu0 %v3713_v20  ;;  %v3743_v20 = vpack.c.bf16 %v1407_v18, %v1406_v15  ;;  %v1562_v15 = vld [vmem:[#allocation5 + $0x1e8] sm:$0xff]  ;;  %v1563_v18 = vld [vmem:[#allocation5 + $0x1f0] sm:$0xff] }
 0xac8   :  { %3721 = vmatprep.subr.bf16.mxu0 %v4079_v0 }
 0xb99   :  { %v831_v25 = vpop.f32.mrb[8].mxu0 }
 0xb9a   :  { %v3377_v19 = vpop.f32.mrb[9].mxu0  ;;  %v839_v26 = vsel %vm50_vm1, -1e+30, %v831_v25  ;;  %v835_v28 = vsel %vm50_vm1, %v831_v25, -1e+30 }
 0xb9b   :  { %v840_v29 = vsel %vm185_vm7, %v839_v26, -inf  ;;  %v836_v30 = vsel %vm185_vm7, %v835_v28, -inf  ;;  %v3100_v26 = vld [vmem:[#allocation5 + $0x1dc] ss:$0 sm:$0xff] }
 0xb9c   :  { %841 = vmax.xlane.f32.xlu0 %v840_v29  ;;  %837 = vmax.xlane.f32.xlu1 %v836_v30  ;;  %v3101_v29 = vld [vmem:[#allocation5 + $0x1dd] ss:$0 sm:$0xff] }
 0xc29   :  { %v842_v31 = vpop.xlane.xlu0 %841  ;;  %v838_v32 = vpop.xlane.xlu1 %837 }
 0xc2a   :  { %v843_v33 = vsel %vm50_vm1, %v838_v32, %v842_v31  ;;  %v735_v32 = vld [vmem:[#allocation5 + $0xa0] sm:$0xff] }
 0xc2b   :  { %v844_v34 = vsub.f32 %v831_v25, %v843_v33  ;;  %v736_v33 = vld [vmem:[#allocation5 + $0xa8] sm:$0xff] }
 0xc2d   :  { %v845_v35 = vmul.f32 1.442695, %v844_v34  ;;  %v3719_v34 = vpack.c.bf16 %v736_v33, %v735_v32  ;;  %v1380_v32 = vld [vmem:[#allocation5 + $0xd0] sm:$0xff]  ;;  %v1381_v33 = vld [vmem:[#allocation5 + $0xd8] sm:$0xff] }
 0xc2f   :  { %3955 = vpow2.f32 %v845_v35  ;;  %v3102_v35 = vld [vmem:[#allocation5 + $0x1d5] ss:$0 sm:$0xff] }
 0xc39   :  { %v3956_v36 = vpop.eup %3955 }
 0xc3a   :  { %v851_v37 = vsel %vm50_vm1, 0.0, %v3956_v36  ;;  %v847_v38 = vsel %vm50_vm1, %v3956_v36, 0.0 }
 0xc3b   :  { %v852_v39 = vsel %vm185_vm7, %v851_v37, 0.0  ;;  %v848_v40 = vsel %vm185_vm7, %v847_v38, 0.0 }
 0xc3c   :  { %853 = vadd.xlane.f32.xlu1 %v852_v39  ;;  %849 = vadd.xlane.f32.xlu0 %v848_v40  ;;  %v3104_v40 = vld [vmem:[#allocation5 + $0x1d7] ss:$0 sm:$0xff] }
 0xc52   :  { %3923 = vrot.lane.b32.xlu0 %v3922_v43, %s4085_s11 }
 0xcc9   :  { %v854_v44 = vpop.xlane.xlu1 %853  ;;  %v850_v45 = vpop.xlane.xlu0 %849 }
 0xcca   :  { %v855_v49 = vsel %vm50_vm1, %v850_v45, %v854_v44 }
 0xccb   :  { %3957 = vrcp.f32 %v855_v49 }
 0xccd   :  { %v3924_v50 = vpop.permute.xlu0 %3923 }
 0xcce   :  { %v3926_v51 = vunpack.i.h.bf16 %v3924_v50  ;;  %v3925_v52 = vunpack.i.l.bf16 %v3924_v50 }
 0xcd0   :  { %v3707_v53 = vpack.c.bf16 %v3926_v51, %v3925_v52 }
 0xcd2   :  { %3708 = vmatpush3.bf16.msra.mxu1 %v3707_v53 }
 0xcd3   :  { %3709 = vmatprep.subr.bf16.mxu1 %v4079_v0 }
 0xcd5   :  { %v3958_v56 = vpop.eup %3957 }
 0xcd6   :  { %v857_v58 = vmul.f32 %v3958_v56, %v3956_v36  ;;  %v3722_v56 = vpack.c.bf16 %v1222_v55, %v1221_v54  ;;  %v1392_v54 = vld [vmem:[#allocation5 + $0x130] sm:$0xff]  ;;  %v1393_v55 = vld [vmem:[#allocation5 + $0x138] sm:$0xff] }
 0xcd8   :  { %3383 = vmatmul.mubr.msk.f32.vlgmr.msra.gmra.mrb[6].mxu1 %vm185_vm7, %v857_v58  ;;  %v1397_v58 = vld [vmem:[#allocation5 + $0x158] sm:$0xff] }
 0xcd9   :  { %3711 = vmatpush3.bf16.msra.mxu1 %v3710_v57  ;;  %3389 = vmatprep.mubr.msk.f32.mxu1 %vm4080_vm0, %v4081_v1  ;;  %v1396_v57 = vld [vmem:[#allocation5 + $0x150] sm:$0xff] }
 0xcda   :  { %3715 = vmatprep.subr.bf16.mxu1 %v4079_v0 }
 0xdab   :  { %v935_v59 = vpop.f32.mrb[6].mxu1 }
 0xdac   :  { %v3384_v60 = vpop.f32.mrb[7].mxu1  ;;  %3390 = vmatmul.mubr.msk.f32.vlgmr.msra.gmra.mrb[8].mxu1 %vm185_vm7, %v935_v59  ;;  %v3728_v59 = vpack.c.bf16 %v1397_v58, %v1396_v57  ;;  %v1408_v57 = vld [vmem:[#allocation5 + $0x1b0] sm:$0xff]  ;;  %v1409_v58 = vld [vmem:[#allocation5 + $0x1b8] sm:$0xff] }
 0xdad   :  { %3407 = vmatprep.mubr.msk.f32.mxu1 %vm4080_vm0, %v4081_v1  ;;  %3717 = vmatpush3.bf16.msra.mxu1 %v3716_v23  ;;  %v1398_v60 = vld [vmem:[#allocation5 + $0x160] sm:$0xff] }
 0xdae   :  { %3718 = vmatprep.subr.bf16.mxu1 %v4079_v0 }
 0xdb1   :  { %3720 = vmatpush3.bf16.msra.mxu1 %v3719_v34 }
 0xdb2   :  { %3727 = vmatprep.subr.bf16.mxu1 %v4079_v0 }
 0xe7f   :  { %v1012_v62 = vpop.f32.mrb[8].mxu1 }
 0xe80   :  { %v1013_v63 = vadd.f32 %v3098_v61, %v1012_v62  ;;  %v3391_v2 = vpop.f32.mrb[9].mxu1  ;;  %v1399_v61 = vld [vmem:[#allocation5 + $0x168] sm:$0xff] }
 0xe81   :  { %v3731_v62 = vpack.c.bf16 %v1399_v61, %v1398_v60  ;;  %v1401_v2 = vld [vmem:[#allocation5 + $0x178] sm:$0xff]  ;;  %v1394_v60 = vld [vmem:[#allocation5 + $0x140] sm:$0xff]  ;;  %v1395_v61 = vld [vmem:[#allocation5 + $0x148] sm:$0xff] }
 0xe82   :  { %v1016_v4 = vadd.f32 %v1013_v63, %v4241_v7  ;;  %v1400_v63 = vld [vmem:[#allocation5 + $0x170] sm:$0xff] }
 0xe84   :  { %v1017_v5 = vsel %vm185_vm7, %v1016_v4, 0.0 }
 0xe85   :  { %1018 = vadd.xlane.f32.xlu1 %v1017_v5  ;;  %v1402_v5 = vld [vmem:[#allocation5 + $0x180] sm:$0xff] }
 0xf12   :  { %v1019_v6 = vpop.xlane.xlu1 %1018 }
 0xf13   :  { %v1020_v12 = vmul.f32 0.0625, %v1019_v6  ;;  %v1403_v6 = vld [vmem:[#allocation5 + $0x188] sm:$0xff] }
 0xf15   :  { %v1021_v11 = vsub.f32 %v1016_v4, %v1020_v12  ;;  %v3734_v4 = vpack.c.bf16 %v1401_v2, %v1400_v63  ;;  %v3737_v12 = vpack.c.bf16 %v1403_v6, %v1402_v5  ;;  %v1410_v63 = vld [vmem:[#allocation5 + $0x1c0] sm:$0xff]  ;;  %v1411_v2 = vld [vmem:[#allocation5 + $0x1c8] sm:$0xff] }
 0xf16   :  { %v3108_v5 = vld [vmem:[#allocation5 + $0x1e0] ss:$0 sm:$0xff] }
 0xf17   :  { %v1022_v13 = vmul.f32 %v1021_v11, %v1021_v11 }
 0xf19   :  { %v1023_v14 = vsel %vm185_vm7, %v1022_v13, 0.0  ;;  %v1405_v13 = vld [vmem:[#allocation5 + $0x198] sm:$0xff] }
 0xf1a   :  { %1024 = vadd.xlane.f32.xlu1 %v1023_v14 }
 0xfa7   :  { %v1025_v7 = vpop.xlane.xlu1 %1024 }
 0xfa8   :  { %v1026_v24 = vmul.f32 0.0625, %v1025_v7 }
 0xfaa   :  { %v1027_v25 = vadd.f32 1e-05, %v1026_v24  ;;  %v3106_v24 = vld [vmem:[#allocation5 + $0x1de] ss:$0 sm:$0xff] }
 0xfac   :  { %3959 = vrsqrt.f32 %v1027_v25 }
 0xfb6   :  { %v3960_v19 = vpop.eup %3959 }
 0xfb7   :  { %v1029_v28 = vmul.f32 %v3960_v19, %v1021_v11  ;;  %v1404_v11 = vld [vmem:[#allocation5 + $0x190] sm:$0xff]  ;;  %v1302_v19 = vld [vmem:[#allocation5 + $0xc0] sm:$0xff] }
 0xfb8   :  { %v3740_v14 = vpack.c.bf16 %v1405_v13, %v1404_v11  ;;  %v3110_v13 = vld [vmem:[#allocation5 + $0x1e1] ss:$0 sm:$0xff] }
 0xfb9   :  { %v1034_v30 = vmul.f32 %v3100_v26, %v1029_v28  ;;  %v1303_v26 = vld [vmem:[#allocation5 + $0xc8] sm:$0xff]  ;;  %v3107_v28 = vld [vmem:[#allocation5 + $0x1df] ss:$0 sm:$0xff] }
 0xfbb   :  { %v1039_v31 = vadd.f32 %v3101_v29, %v1034_v30  ;;  %v3725_v30 = vpack.c.bf16 %v1303_v26, %v1302_v19  ;;  %v1560_v26 = vld [vmem:[#allocation2 + $0x8] sm:$0xff] }
 0xfbd   :  { %3397 = vmatmul.mubr.msk.f32.vlgmr.msra.gmra.mrb[10].mxu0 %vm185_vm7, %v1039_v31 }
 0xfbe   :  { %3414 = vmatprep.mubr.msk.f32.mxu0 %vm4080_vm0, %v4081_v1  ;;  %3723 = vmatpush3.bf16.msra.mxu0 %v3722_v56  ;;  %v3770_v56 = vpack.c.bf16 %v1393_v55, %v1392_v54 }
 0xfbf   :  { %3724 = vmatprep.subr.bf16.mxu0 %v4079_v0 }
0x1090   :  { %v1113_v36 = vpop.f32.mrb[10].mxu0 }
0x1091   :  { %v1114_v37 = vadd.f32 %v3102_v35, %v1113_v36  ;;  %v3398_v38 = vpop.f32.mrb[11].mxu0  ;;  %v3752_v35 = vpack.c.bf16 %v1381_v33, %v1380_v32  ;;  %v1382_v36 = vld [vmem:[#allocation5 + $0xe0] sm:$0xff] }
0x1093   :  { %v1117_v39 = vmax.f32 %v1114_v37, 0.0  ;;  %v1383_v37 = vld [vmem:[#allocation5 + $0xe8] sm:$0xff] }
0x1094   :  { %v3755_v38 = vpack.c.bf16 %v1383_v37, %v1382_v36 }
0x1095   :  { %3408 = vmatmul.mubr.msk.f32.vlgmr.msra.gmra.mrb[10].mxu1 %vm69_vm6, %v1117_v39  ;;  %v1384_v39 = vld [vmem:[#allocation5 + $0xf0] sm:$0xff] }
0x1096   :  { %3456 = vmatprep.mubr.msk.f32.mxu1 %vm4080_vm0, %v4081_v1  ;;  %3729 = vmatpush3.bf16.msra.mxu1 %v3728_v59  ;;  %v3746_v59 = vpack.c.bf16 %v1409_v58, %v1408_v57 }
0x1097   :  { %3730 = vmatprep.subr.bf16.mxu1 %v4079_v0 }
0x109a   :  { %3732 = vmatpush3.bf16.msra.mxu1 %v3731_v62  ;;  %v3773_v62 = vpack.c.bf16 %v1395_v61, %v1394_v60 }
0x109b   :  { %3733 = vmatprep.subr.bf16.mxu1 %v4079_v0 }
0x109e   :  { %3735 = vmatpush3.bf16.msra.mxu1 %v3734_v4  ;;  %v3749_v4 = vpack.c.bf16 %v1411_v2, %v1410_v63 }
0x109f   :  { %3736 = vmatprep.subr.bf16.mxu1 %v4079_v0 }
0x10a2   :  { %3738 = vmatpush3.bf16.msra.mxu1 %v3737_v12 }
0x10a3   :  { %3739 = vmatprep.subr.bf16.mxu1 %v4079_v0 }
0x10a6   :  { %3741 = vmatpush3.bf16.msra.mxu1 %v3740_v14 }
0x10a7   :  { %3742 = vmatprep.subr.bf16.mxu1 %v4079_v0 }
0x10aa   :  { %3744 = vmatpush3.bf16.msra.mxu1 %v3743_v20 }
0x10ab   :  { %3745 = vmatprep.subr.bf16.mxu1 %v4079_v0 }
0x10ae   :  { %3747 = vmatpush3.bf16.msra.mxu1 %v3746_v59 }
0x10af   :  { %3748 = vmatprep.subr.bf16.mxu1 %v4079_v0 }
0x10b2   :  { %3750 = vmatpush3.bf16.msra.mxu1 %v3749_v4 }
0x10b3   :  { %3775 = vmatprep.subr.bf16.mxu1 %v4079_v0 }
0x1168   :  { %v1191_v41 = vpop.f32.mrb[10].mxu1 }
0x1169   :  { %v1192_v42 = vadd.f32 %v3104_v40, %v1191_v41  ;;  %v3409_v43 = vpop.f32.mrb[11].mxu1  ;;  %v1385_v40 = vld [vmem:[#allocation5 + $0xf8] sm:$0xff] }
0x116a   :  { %v3758_v41 = vpack.c.bf16 %v1385_v40, %v1384_v39  ;;  %v1387_v43 = vld [vmem:[#allocation5 + $0x108] sm:$0xff] }
0x116b   :  { %v1195_v44 = vadd.f32 %v1192_v42, %v1039_v31  ;;  %v1386_v42 = vld [vmem:[#allocation5 + $0x100] sm:$0xff] }
0x116d   :  { %v1196_v45 = vsel %vm185_vm7, %v1195_v44, 0.0 }
0x116e   :  { %1197 = vadd.xlane.f32.xlu1 %v1196_v45  ;;  %v1388_v45 = vld [vmem:[#allocation5 + $0x110] sm:$0xff] }
0x11fb   :  { %v1198_v49 = vpop.xlane.xlu1 %1197 }
0x11fc   :  { %v1199_v50 = vmul.f32 0.0625, %v1198_v49  ;;  %v1389_v49 = vld [vmem:[#allocation5 + $0x118] sm:$0xff] }
0x11fe   :  { %v1200_v51 = vsub.f32 %v1195_v44, %v1199_v50  ;;  %v3761_v44 = vpack.c.bf16 %v1387_v43, %v1386_v42  ;;  %v3764_v50 = vpack.c.bf16 %v1389_v49, %v1388_v45 }
0x1200   :  { %v1201_v52 = vmul.f32 %v1200_v51, %v1200_v51 }
0x1202   :  { %v1202_v53 = vsel %vm185_vm7, %v1201_v52, 0.0  ;;  %v1391_v52 = vld [vmem:[#allocation5 + $0x128] sm:$0xff] }
0x1203   :  { %1203 = vadd.xlane.f32.xlu1 %v1202_v53 }
0x1290   :  { %v1204_v21 = vpop.xlane.xlu1 %1203 }
0x1291   :  { %v1205_v22 = vmul.f32 0.0625, %v1204_v21 }
0x1293   :  { %v1206_v23 = vadd.f32 1e-05, %v1205_v22 }
0x1295   :  { %3961 = vrsqrt.f32 %v1206_v23  ;;  %v3776_v23 = vpack.c.bf16 %v1563_v18, %v1562_v15 }
0x129f   :  { %v3962_v7 = vpop.eup %3961 }
0x12a0   :  { %v1208_v25 = vmul.f32 %v3962_v7, %v1200_v51  ;;  %v1390_v51 = vld [vmem:[#allocation5 + $0x120] sm:$0xff] }
0x12a1   :  { %v3767_v53 = vpack.c.bf16 %v1391_v52, %v1390_v51 }
0x12a2   :  { %v1213_v29 = vmul.f32 %v3106_v24, %v1208_v25  ;;  %v1564_v24 = vld [vmem:[#allocation5 + $0x1f8] sm:$0xff]  ;;  %v1565_v25 = vld [vmem:[#allocation5 + $0x200] sm:$0xff] }
0x12a3   :  { %v3779_v19 = vpack.c.bf16 %v1565_v25, %v1564_v24  ;;  %v3119_v25 = vld [vmem:[#allocation5 + $0x3ba] ss:$0 sm:$0xff] }
0x12a4   :  { %v1218_v31 = vadd.f32 %v3107_v28, %v1213_v29 }
0x12a6   :  { %3415 = vmatmul.mubr.msk.f32.vlgmr.msra.gmra.mrb[12].mxu0 %vm185_vm7, %v1218_v31  ;;  %v1219_v34 = vsel %vm185_vm7, %v1218_v31, 0.0 }
0x12a7   :  { %3726 = vmatpush3.bf16.msra.mxu0 %v3725_v30  ;;  %3421 = vmatprep.mubr.msk.f32.mxu0 %vm4080_vm0, %v4081_v1  ;;  %1220 = vst [vmem:[#allocation7] sm:$0xff] %v1219_v34 }
0x12a8   :  { %3751 = vmatprep.subr.bf16.mxu0 %v4079_v0 }
0x12aa   :  { %3422 = vmatmul.mubr.msk.f32.vlgmr.msra.gmra.mrb[14].mxu0 %vm185_vm7, %v1218_v31  ;;  %v3112_v31 = vld [vmem:[#allocation5 + $0x1e2] ss:$0 sm:$0xff] }
0x12ab   :  { %3753 = vmatpush3.bf16.msra.mxu0 %v3752_v35  ;;  %3491 = vmatprep.mubr.msk.f32.mxu0 %vm4080_vm0, %v4081_v1  ;;  %v3113_v35 = vld [vmem:[#allocation5 + $0x3b8] ss:$0 sm:$0xff] }
0x12ac   :  { %3754 = vmatprep.subr.bf16.mxu0 %v4079_v0 }
0x12af   :  { %3756 = vmatpush3.bf16.msra.mxu0 %v3755_v38 }
0x12b0   :  { %3757 = vmatprep.subr.bf16.mxu0 %v4079_v0 }
0x12b3   :  { %3759 = vmatpush3.bf16.msra.mxu0 %v3758_v41 }
0x12b4   :  { %3760 = vmatprep.subr.bf16.mxu0 %v4079_v0 }
0x12b7   :  { %3762 = vmatpush3.bf16.msra.mxu0 %v3761_v44 }
0x12b8   :  { %3763 = vmatprep.subr.bf16.mxu0 %v4079_v0 }
0x12bb   :  { %3765 = vmatpush3.bf16.msra.mxu0 %v3764_v50 }
0x12bc   :  { %3766 = vmatprep.subr.bf16.mxu0 %v4079_v0 }
0x12bf   :  { %3768 = vmatpush3.bf16.msra.mxu0 %v3767_v53 }
0x12c0   :  { %3769 = vmatprep.subr.bf16.mxu0 %v4079_v0 }
0x12c3   :  { %3771 = vmatpush3.bf16.msra.mxu0 %v3770_v56 }
0x12c4   :  { %3772 = vmatprep.subr.bf16.mxu0 %v4079_v0 }
0x12c7   :  { %3774 = vmatpush3.bf16.msra.mxu0 %v3773_v62 }
0x12c8   :  { %3781 = vmatprep.subr.bf16.mxu0 %v4079_v0 }
0x1379   :  { %v1297_v6 = vpop.f32.mrb[12].mxu0 }
0x137a   :  { %v1298_v12 = vadd.f32 %v3108_v5, %v1297_v6  ;;  %v3416_v11 = vpop.f32.mrb[13].mxu0 }
0x137b   :  { %v1644_v11 = vld [vmem:[#allocation5 + $0x218] sm:$0xff] }
0x137c   :  { %v1301_v14 = vmax.f32 %v1298_v12, 0.0 }
0x137d   :  { %v1375_v20 = vpop.f32.mrb[14].mxu0 }
0x137e   :  { %v1376_v21 = vadd.f32 %v3110_v13, %v1375_v20  ;;  %v3423_v22 = vpop.f32.mrb[15].mxu0  ;;  %3492 = vmatmul.mubr.f32.vlgmr.msra.gmra.mrb[16].mxu0 %v1301_v14  ;;  %v1645_v13 = vld [vmem:[#allocation5 + $0x220] sm:$0xff] }
0x137f   :  { %3509 = vmatprep.mubr.msk.f32.mxu0 %vm4080_vm0, %v4081_v1  ;;  %v3789_v14 = vpack.c.bf16 %v1645_v13, %v1644_v11 }
0x1380   :  { %v1379_v7 = vmax.f32 %v1376_v21, 0.0 }
0x1382   :  { %3457 = vmatmul.mubr.f32.vlgmr.msra.gmra.mrb[12].mxu1 %v1379_v7 }
0x1383   :  { %3777 = vmatpush3.bf16.msra.mxu1 %v3776_v23  ;;  %3502 = vmatprep.mubr.msk.f32.mxu1 %vm4080_vm0, %v4081_v1 }
0x1384   :  { %3778 = vmatprep.subr.bf16.mxu1 %v4079_v0 }
0x1387   :  { %3780 = vmatpush3.bf16.msra.mxu1 %v3779_v19 }
0x1388   :  { %3785 = vmatprep.subr.bf16.mxu1 %v4079_v0 }
0x138a   :  { %3503 = vmatmul.mubr.msk.f32.vlgmr.msra.gmra.mrb[14].mxu1 %vm69_vm6, %v1560_v26 }
0x138b   :  { %3516 = vmatprep.mubr.msk.f32.mxu1 %vm4080_vm0, %v4081_v1 }
0x1451   :  { %v1548_v28 = vpop.f32.mrb[16].mxu0 }
0x1452   :  { %v3493_v29 = vpop.f32.mrb[17].mxu0 }
0x1455   :  { %v1478_v30 = vpop.f32.mrb[12].mxu1 }
0x1456   :  { %v1549_v32 = vadd.f32 %v1548_v28, %v1478_v30  ;;  %v3458_v33 = vpop.f32.mrb[13].mxu1 }
0x1458   :  { %v1557_v34 = vadd.f32 %v3112_v31, %v1549_v32 }
0x145a   :  { %1558 = vst [vmem:[#allocation8] sm:$0xff] %v1557_v34 }
0x145d   :  { %v1640_v36 = vpop.f32.mrb[14].mxu1 }
0x145e   :  { %v4337_v37 = vadd.f32 %v3113_v35, %v1640_v36  ;;  %v3504_v38 = vpop.f32.mrb[15].mxu1  ;;  %v1647_v36 = vld [vmem:[#allocation5 + $0x238] sm:$0xff] }
0x145f   :  { %v1648_v38 = vld [vmem:[#allocation5 + $0x240] sm:$0xff] }
0x1460   :  { %1664 = vrot.lane.b32.xlu0 %v4337_v37, %s4084_s10  ;;  %v1659_v39 = vmul.f32 %v4166_v17, %v4337_v37  ;;  %v1660_v40 = vmul.f32 %v4164_v16, %v4337_v37  ;;  %v1661_v5 = vmul.f32 %v3905_v48, %v4337_v37  ;;  %v1662_v6 = vmul.f32 %v3906_v47, %v4337_v37 }
0x1462   :  { %v3927_v41 = vpack.i.bf16 %v1660_v40, %v1659_v39  ;;  %v3932_v12 = vpack.i.bf16 %v1662_v6, %v1661_v5  ;;  %v3792_v39 = vpack.c.bf16 %v1648_v38, %v1647_v36  ;;  %v1650_v40 = vld [vmem:[#allocation5 + $0x258] sm:$0xff] }
0x1464   :  { %3928 = vrot.lane.b32.xlu1 %v3927_v41, %s4085_s11  ;;  %v1651_v41 = vld [vmem:[#allocation5 + $0x260] sm:$0xff] }
0x14d2   :  { %v1665_v49 = vpop.permute.xlu0 %1664 }
0x14d6   :  { %v3929_v42 = vpop.permute.xlu1 %3928 }
0x14d7   :  { %v3931_v43 = vunpack.i.h.bf16 %v3929_v42  ;;  %v3930_v44 = vunpack.i.l.bf16 %v3929_v42  ;;  %v3795_v42 = vpack.c.bf16 %v1651_v41, %v1650_v40 }
0x14d9   :  { %v3782_v45 = vpack.c.bf16 %v3931_v43, %v3930_v44 }
0x14db   :  { %3784 = vmatpush3.bf16.xpose.msk.msra.mxu0 %vm4179_vm8, %v3782_v45 }
0x14dc   :  { %3788 = vmatprep.subr.bf16.mxu0 %v4079_v0 }
0x14e2   :  { %3510 = vmatmul.mubr.msk.f32.vlgmr.msra.gmra.mrb[18].mxu0 %vm185_vm7, %v1665_v49  ;;  %v3121_v49 = vld [vmem:[#allocation5 + $0x3c0] ss:$0 sm:$0xff] }
0x14e3   :  { %3523 = vmatprep.mubr.msk.f32.mxu0 %vm4080_vm0, %v4081_v1  ;;  %3790 = vmatpush3.bf16.msra.mxu0 %v3789_v14 }
0x14e4   :  { %3794 = vmatprep.subr.bf16.mxu0 %v4079_v0 }
0x15b5   :  { %v1744_v50 = vpop.f32.mrb[18].mxu0 }
0x15b6   :  { %v3511_v51 = vpop.f32.mrb[19].mxu0  ;;  %v1752_v52 = vsel %vm50_vm1, -1e+30, %v1744_v50  ;;  %v1748_v53 = vsel %vm50_vm1, %v1744_v50, -1e+30 }
0x15b7   :  { %v1753_v54 = vsel %vm185_vm7, %v1752_v52, -inf  ;;  %v1749_v55 = vsel %vm185_vm7, %v1748_v53, -inf  ;;  %v3122_v51 = vld [vmem:[#allocation5 + $0x3c1] ss:$0 sm:$0xff] }
0x15b8   :  { %1754 = vmax.xlane.f32.xlu1 %v1753_v54  ;;  %1750 = vmax.xlane.f32.xlu0 %v1749_v55  ;;  %v1652_v54 = vld [vmem:[#allocation5 + $0x268] sm:$0xff]  ;;  %v1653_v55 = vld [vmem:[#allocation5 + $0x270] sm:$0xff] }
0x1645   :  { %v1755_v56 = vpop.xlane.xlu1 %1754  ;;  %v1751_v57 = vpop.xlane.xlu0 %1750 }
0x1646   :  { %v1756_v58 = vsel %vm50_vm1, %v1751_v57, %v1755_v56  ;;  %v3798_v56 = vpack.c.bf16 %v1653_v55, %v1652_v54  ;;  %v3123_v57 = vld [vmem:[#allocation5 + $0x3bc] ss:$0 sm:$0xff] }
0x1647   :  { %v1757_v59 = vsub.f32 %v1744_v50, %v1756_v58 }
0x1649   :  { %v1758_v60 = vmul.f32 1.442695, %v1757_v59 }
0x164b   :  { %3963 = vpow2.f32 %v1758_v60 }
0x1655   :  { %v3964_v61 = vpop.eup %3963 }
0x1656   :  { %v1760_v62 = vsel %vm50_vm1, %v3964_v61, 0.0  ;;  %v1764_v2 = vsel %vm50_vm1, 0.0, %v3964_v61 }
0x1657   :  { %v1761_v63 = vsel %vm185_vm7, %v1760_v62, 0.0  ;;  %v1765_v4 = vsel %vm185_vm7, %v1764_v2, 0.0  ;;  %v3125_v62 = vld [vmem:[#allocation5 + $0x3be] ss:$0 sm:$0xff] }
0x1658   :  { %1762 = vadd.xlane.f32.xlu0 %v1761_v63 }
0x165c   :  { %1766 = vadd.xlane.f32.xlu0 %v1765_v4 }
0x1672   :  { %3933 = vrot.lane.b32.xlu0 %v3932_v12, %s4087_s13 }
0x16e5   :  { %v1763_v15 = vpop.xlane.xlu0 %1762 }
0x16e9   :  { %v1767_v18 = vpop.xlane.xlu0 %1766 }
0x16ea   :  { %v1768_v20 = vsel %vm50_vm1, %v1763_v15, %v1767_v18  ;;  %v2132_v18 = vld [vmem:[#allocation5 + $0x208] sm:$0xff] }
0x16eb   :  { %3965 = vrcp.f32 %v1768_v20  ;;  %v2133_v20 = vld [vmem:[#allocation5 + $0x210] sm:$0xff] }
0x16ed   :  { %v3934_v48 = vpop.permute.xlu0 %3933 }
0x16ee   :  { %v3936_v21 = vunpack.i.h.bf16 %v3934_v48  ;;  %v3935_v22 = vunpack.i.l.bf16 %v3934_v48  ;;  %v3801_v48 = vpack.c.bf16 %v2133_v20, %v2132_v18 }
0x16f0   :  { %v3786_v46 = vpack.c.bf16 %v3936_v21, %v3935_v22 }
0x16f2   :  { %3787 = vmatpush3.bf16.msra.mxu1 %v3786_v46 }
0x16f3   :  { %3791 = vmatprep.subr.bf16.mxu1 %v4079_v0 }
0x16f5   :  { %v3966_v47 = vpop.eup %3965 }
0x16f6   :  { %v1770_v23 = vmul.f32 %v3966_v47, %v3964_v61 }
0x16f8   :  { %3517 = vmatmul.mubr.msk.f32.vlgmr.msra.gmra.mrb[16].mxu1 %vm185_vm7, %v1770_v23  ;;  %v3127_v23 = vld [vmem:[#allocation5 + $0x3c2] ss:$0 sm:$0xff] }
0x16f9   :  { %3530 = vmatprep.mubr.msk.f32.mxu1 %vm4080_vm0, %v4081_v1  ;;  %3793 = vmatpush3.bf16.msra.mxu1 %v3792_v39 }
0x16fa   :  { %3800 = vmatprep.subr.bf16.mxu1 %v4079_v0 }
0x17cb   :  { %v1848_v7 = vpop.f32.mrb[16].mxu1 }
0x17cc   :  { %v3518_v24 = vpop.f32.mrb[17].mxu1  ;;  %3524 = vmatmul.mubr.msk.f32.vlgmr.msra.gmra.mrb[20].mxu0 %vm185_vm7, %v1848_v7 }
0x17cd   :  { %3541 = vmatprep.mubr.msk.f32.mxu0 %vm4080_vm0, %v4081_v1  ;;  %3796 = vmatpush3.bf16.msra.mxu0 %v3795_v42  ;;  %v3128_v24 = vld [vmem:[#allocation5 + $0x3c3] ss:$0 sm:$0xff] }
0x17ce   :  { %3797 = vmatprep.subr.bf16.mxu0 %v4079_v0 }
0x17d1   :  { %3799 = vmatpush3.bf16.msra.mxu0 %v3798_v56 }
0x17d2   :  { %3807 = vmatprep.subr.bf16.mxu0 %v4079_v0 }
0x189f   :  { %v1925_v19 = vpop.f32.mrb[20].mxu0 }
0x18a0   :  { %v1926_v26 = vadd.f32 %v3119_v25, %v1925_v19  ;;  %v3525_v28 = vpop.f32.mrb[21].mxu0 }
0x18a2   :  { %v1929_v29 = vadd.f32 %v1926_v26, %v4337_v37  ;;  %v3129_v26 = vld [vmem:[#allocation5 + $0x3b9] ss:$0 sm:$0xff] }
0x18a4   :  { %v1930_v30 = vsel %vm185_vm7, %v1929_v29, 0.0 }
0x18a5   :  { %1931 = vadd.xlane.f32.xlu1 %v1930_v30 }
0x1932   :  { %v1932_v31 = vpop.xlane.xlu1 %1931 }
0x1933   :  { %v1933_v32 = vmul.f32 0.0625, %v1932_v31 }
0x1935   :  { %v1934_v33 = vsub.f32 %v1929_v29, %v1933_v32 }
0x1937   :  { %v1935_v34 = vmul.f32 %v1934_v33, %v1934_v33 }
0x1939   :  { %v1936_v35 = vsel %vm185_vm7, %v1935_v34, 0.0 }
0x193a   :  { %1937 = vadd.xlane.f32.xlu1 %v1936_v35 }
0x19c7   :  { %v1938_v37 = vpop.xlane.xlu1 %1937 }
0x19c8   :  { %v1939_v43 = vmul.f32 0.0625, %v1938_v37 }
0x19ca   :  { %v1940_v44 = vadd.f32 1e-05, %v1939_v43 }
0x19cc   :  { %3967 = vrsqrt.f32 %v1940_v44 }
0x19d6   :  { %v3968_v45 = vpop.eup %3967 }
0x19d7   :  { %v1942_v50 = vmul.f32 %v3968_v45, %v1934_v33 }
0x19d9   :  { %v1947_v52 = vmul.f32 %v3121_v49, %v1942_v50 }
0x19db   :  { %v1952_v53 = vadd.f32 %v3122_v51, %v1947_v52 }
0x19dd   :  { %3531 = vmatmul.mubr.msk.f32.vlgmr.msra.gmra.mrb[18].mxu1 %vm185_vm7, %v1952_v53 }
0x19de   :  { %3548 = vmatprep.mubr.msk.f32.mxu1 %vm4080_vm0, %v4081_v1  ;;  %3802 = vmatpush3.bf16.msra.mxu1 %v3801_v48 }
0x19df   :  { %3803 = vmatprep.subr.bf16.mxu1 %v4079_v0 }
0x1ab0   :  { %v2026_v58 = vpop.f32.mrb[18].mxu1 }
0x1ab1   :  { %v2027_v59 = vadd.f32 %v3123_v57, %v2026_v58  ;;  %v3532_v60 = vpop.f32.mrb[19].mxu1 }
0x1ab3   :  { %v2030_v61 = vmax.f32 %v2027_v59, 0.0 }
0x1ab5   :  { %3542 = vmatmul.mubr.msk.f32.vlgmr.msra.gmra.mrb[22].mxu0 %vm69_vm6, %v2030_v61 }
0x1ab6   :  { %3562 = vmatprep.mubr.msk.f32.mxu0 %vm4080_vm0, %v4081_v1 }
0x1b88   :  { %v2104_v63 = vpop.f32.mrb[22].mxu0 }
0x1b89   :  { %v2105_v2 = vadd.f32 %v3125_v62, %v2104_v63  ;;  %v3543_v4 = vpop.f32.mrb[23].mxu0  ;;  %v2212_v63 = vld [vmem:[#allocation5 + $0x228] sm:$0xff] }
0x1b8b   :  { %v2108_v5 = vadd.f32 %v2105_v2, %v1952_v53  ;;  %v2213_v2 = vld [vmem:[#allocation5 + $0x230] sm:$0xff] }
0x1b8d   :  { %v2109_v6 = vsel %vm185_vm7, %v2108_v5, 0.0 }
0x1b8e   :  { %2110 = vadd.xlane.f32.xlu1 %v2109_v6  ;;  %v3135_v6 = vld [vmem:[#allocation5 + $0x3bb] ss:$0 sm:$0xff] }
0x1c1b   :  { %v2111_v12 = vpop.xlane.xlu1 %2110 }
0x1c1c   :  { %v2112_v11 = vmul.f32 0.0625, %v2111_v12 }
0x1c1e   :  { %v2113_v13 = vsub.f32 %v2108_v5, %v2112_v11 }
0x1c20   :  { %v2114_v14 = vmul.f32 %v2113_v13, %v2113_v13 }
0x1c22   :  { %v2115_v15 = vsel %vm185_vm7, %v2114_v14, 0.0 }
0x1c23   :  { %2116 = vadd.xlane.f32.xlu1 %v2115_v15 }
0x1cb0   :  { %v2117_v21 = vpop.xlane.xlu1 %2116 }
0x1cb1   :  { %v2118_v22 = vmul.f32 0.0625, %v2117_v21 }
0x1cb3   :  { %v2119_v46 = vadd.f32 1e-05, %v2118_v22 }
0x1cb5   :  { %3969 = vrsqrt.f32 %v2119_v46  ;;  %v2215_v46 = vld [vmem:[#allocation5 + $0x248] sm:$0xff] }
0x1cbf   :  { %v3970_v47 = vpop.eup %3969 }
0x1cc0   :  { %v2121_v7 = vmul.f32 %v3970_v47, %v2113_v13  ;;  %v2216_v47 = vld [vmem:[#allocation5 + $0x250] sm:$0xff] }
0x1cc2   :  { %v2126_v25 = vmul.f32 %v3127_v23, %v2121_v7  ;;  %v3814_v23 = vpack.c.bf16 %v2216_v47, %v2215_v46  ;;  %v2218_v7 = vld [vmem:[#allocation5 + $0x278] sm:$0xff]  ;;  %v2783_v46 = vld [vmem:[#allocation5 + $0x2b0] sm:$0xff]  ;;  %v3144_v47 = vld [vmem:[#allocation5 + $0x3c7] ss:$0 sm:$0xff] }
0x1cc4   :  { %v4398_v19 = vadd.f32 %v3128_v24, %v2126_v25  ;;  %v2219_v24 = vld [vmem:[#allocation5 + $0x280] sm:$0xff] }
0x1cc5   :  { %v3817_v25 = vpack.c.bf16 %v2219_v24, %v2218_v7 }
0x1cc6   :  { %3549 = vmatmul.mubr.msk.f32.vlgmr.msra.gmra.mrb[20].mxu1 %vm185_vm7, %v4398_v19 }
0x1cc7   :  { %3555 = vmatprep.mubr.msk.f32.mxu1 %vm4080_vm0, %v4081_v1 }
0x1d99   :  { %v2208_v28 = vpop.f32.mrb[20].mxu1 }
0x1d9a   :  { %v2209_v29 = vadd.f32 %v3129_v26, %v2208_v28  ;;  %v3550_v30 = vpop.f32.mrb[21].mxu1 }
0x1d9b   :  { %v3137_v30 = vld [vmem:[#allocation5 + $0x3c4] ss:$0 sm:$0xff] }
0x1d9c   :  { %v2227_v31 = vmul.f32 %v3915_v10, %v2209_v29  ;;  %v2228_v32 = vmul.f32 %v3916_v9, %v2209_v29  ;;  %v2229_v53 = vmul.f32 %v4166_v17, %v2209_v29  ;;  %v2230_v54 = vmul.f32 %v4164_v16, %v2209_v29 }
0x1d9d   :  { %v3811_v16 = vpack.c.bf16 %v2213_v2, %v2212_v63  ;;  %v2881_v63 = vld [vmem:[#allocation5 + $0x360] sm:$0xff] }
0x1d9e   :  { %v3937_v33 = vpack.i.bf16 %v2228_v32, %v2227_v31  ;;  %v3942_v55 = vpack.i.bf16 %v2230_v54, %v2229_v53  ;;  %v3138_v32 = vld [vmem:[#allocation5 + $0x3c5] ss:$0 sm:$0xff]  ;;  %v2701_v53 = vld [vmem:[#allocation5 + $0x298] sm:$0xff] }
0x1d9f   :  { %v2702_v54 = vld [vmem:[#allocation5 + $0x2a0] sm:$0xff] }
0x1da0   :  { %3938 = vrot.lane.b32.xlu1 %v3937_v33, %s4084_s10 }
0x1e12   :  { %v3939_v34 = vpop.permute.xlu1 %3938 }
0x1e13   :  { %v3941_v35 = vunpack.i.h.bf16 %v3939_v34  ;;  %v3940_v36 = vunpack.i.l.bf16 %v3939_v34 }
0x1e15   :  { %v3804_v38 = vpack.c.bf16 %v3941_v35, %v3940_v36  ;;  %v2220_v35 = vld [vmem:[#allocation5 + $0x288] sm:$0xff]  ;;  %v2221_v36 = vld [vmem:[#allocation5 + $0x290] sm:$0xff] }
0x1e17   :  { %3806 = vmatpush3.bf16.xpose.msk.msra.mxu1 %vm4179_vm8, %v3804_v38  ;;  %v3820_v38 = vpack.c.bf16 %v2221_v36, %v2220_v35  ;;  %v2866_v35 = vld [vmem:[#allocation5 + $0x2e8] sm:$0xff]  ;;  %v2867_v36 = vld [vmem:[#allocation5 + $0x2f0] sm:$0xff] }
0x1e18   :  { %3813 = vmatprep.subr.bf16.mxu1 %v4079_v0 }
0x1e1e   :  { %3556 = vmatmul.mubr.msk.f32.vlgmr.msra.gmra.mrb[22].mxu1 %vm185_vm7, %v2209_v29 }
0x1e1f   :  { %3576 = vmatprep.mubr.msk.f32.mxu1 %vm4080_vm0, %v4081_v1  ;;  %3815 = vmatpush3.bf16.msra.mxu1 %v3814_v23 }
0x1e20   :  { %3822 = vmatprep.subr.bf16.mxu1 %v4079_v0 }
0x1ef1   :  { %v2310_v10 = vpop.f32.mrb[22].mxu1 }
0x1ef2   :  { %v3557_v8 = vpop.f32.mrb[23].mxu1  ;;  %v2318_v9 = vsel %vm50_vm1, -1e+30, %v2310_v10  ;;  %v2314_v39 = vsel %vm50_vm1, %v2310_v10, -1e+30 }
0x1ef3   :  { %v2319_v40 = vsel %vm185_vm7, %v2318_v9, -inf  ;;  %v2315_v27 = vsel %vm185_vm7, %v2314_v39, -inf }
0x1ef4   :  { %2320 = vmax.xlane.f32.xlu1 %v2319_v40  ;;  %2316 = vmax.xlane.f32.xlu0 %v2315_v27  ;;  %v3141_v27 = vld [vmem:[#allocation5 + $0x3bf] ss:$0 sm:$0xff] }
0x1f81   :  { %v2321_v41 = vpop.xlane.xlu1 %2320  ;;  %v2317_v42 = vpop.xlane.xlu0 %2316 }
0x1f82   :  { %v2322_v37 = vsel %vm50_vm1, %v2317_v42, %v2321_v41 }
0x1f83   :  { %v2323_v43 = vsub.f32 %v2310_v10, %v2322_v37  ;;  %v3139_v10 = vld [vmem:[#allocation5 + $0x3bd] ss:$0 sm:$0xff] }
0x1f85   :  { %v2324_v44 = vmul.f32 1.442695, %v2323_v43 }
0x1f87   :  { %3971 = vpow2.f32 %v2324_v44 }
0x1f91   :  { %v3972_v45 = vpop.eup %3971 }
0x1f92   :  { %v2326_v49 = vsel %vm50_vm1, %v3972_v45, 0.0  ;;  %v2330_v51 = vsel %vm50_vm1, 0.0, %v3972_v45 }
0x1f93   :  { %v2327_v50 = vsel %vm185_vm7, %v2326_v49, 0.0  ;;  %v2331_v52 = vsel %vm185_vm7, %v2330_v51, 0.0 }
0x1f94   :  { %2328 = vadd.xlane.f32.xlu0 %v2327_v50 }
0x1f98   :  { %2332 = vadd.xlane.f32.xlu0 %v2331_v52 }
0x1fae   :  { %3943 = vrot.lane.b32.xlu0 %v3942_v55, %s4085_s11  ;;  %v3823_v55 = vpack.c.bf16 %v2702_v54, %v2701_v53  ;;  %v3145_v54 = vld [vmem:[#allocation5 + $0x3c8] ss:$0 sm:$0xff] }
0x2021   :  { %v2329_v56 = vpop.xlane.xlu0 %2328 }
0x2025   :  { %v2333_v57 = vpop.xlane.xlu0 %2332 }
0x2026   :  { %v2334_v58 = vsel %vm50_vm1, %v2329_v56, %v2333_v57  ;;  %v2876_v56 = vld [vmem:[#allocation5 + $0x338] sm:$0xff]  ;;  %v2877_v57 = vld [vmem:[#allocation5 + $0x340] sm:$0xff] }
0x2027   :  { %3973 = vrcp.f32 %v2334_v58  ;;  %v3829_v58 = vpack.c.bf16 %v2877_v57, %v2876_v56 }
0x2029   :  { %v3944_v59 = vpop.permute.xlu0 %3943 }
0x202a   :  { %v3946_v60 = vunpack.i.h.bf16 %v3944_v59  ;;  %v3945_v61 = vunpack.i.l.bf16 %v3944_v59  ;;  %v2878_v59 = vld [vmem:[#allocation5 + $0x348] sm:$0xff] }
0x202c   :  { %v3808_v62 = vpack.c.bf16 %v3946_v60, %v3945_v61  ;;  %v2879_v60 = vld [vmem:[#allocation5 + $0x350] sm:$0xff] }
0x202d   :  { %v3832_v61 = vpack.c.bf16 %v2879_v60, %v2878_v59 }
0x202e   :  { %3809 = vmatpush3.bf16.msra.mxu0 %v3808_v62  ;;  %v2880_v62 = vld [vmem:[#allocation5 + $0x358] sm:$0xff] }
0x202f   :  { %3810 = vmatprep.subr.bf16.mxu0 %v4079_v0  ;;  %v3835_v2 = vpack.c.bf16 %v2881_v63, %v2880_v62 }
0x2031   :  { %v3974_v17 = vpop.eup %3973 }
0x2032   :  { %v2336_v4 = vmul.f32 %v3974_v17, %v3972_v45  ;;  %v2882_v17 = vld [vmem:[#allocation5 + $0x368] sm:$0xff] }
0x2034   :  { %3563 = vmatmul.mubr.msk.f32.vlgmr.msra.gmra.mrb[24].mxu0 %vm185_vm7, %v2336_v4 }
0x2035   :  { %3812 = vmatpush3.bf16.msra.mxu0 %v3811_v16  ;;  %3569 = vmatprep.mubr.msk.f32.mxu0 %vm4080_vm0, %v4081_v1  ;;  %v2883_v16 = vld [vmem:[#allocation5 + $0x370] sm:$0xff] }
0x2036   :  { %3816 = vmatprep.subr.bf16.mxu0 %v4079_v0  ;;  %v3838_v4 = vpack.c.bf16 %v2883_v16, %v2882_v17 }
0x2107   :  { %v2414_v3 = vpop.f32.mrb[24].mxu0 }
0x2108   :  { %v3564_v5 = vpop.f32.mrb[25].mxu0  ;;  %3570 = vmatmul.mubr.msk.f32.vlgmr.msra.gmra.mrb[26].mxu0 %vm185_vm7, %v2414_v3  ;;  %v2884_v3 = vld [vmem:[#allocation5 + $0x378] sm:$0xff] }
0x2109   :  { %3587 = vmatprep.mubr.msk.f32.mxu0 %vm4080_vm0, %v4081_v1  ;;  %3818 = vmatpush3.bf16.msra.mxu0 %v3817_v25  ;;  %v2885_v5 = vld [vmem:[#allocation5 + $0x380] sm:$0xff]  ;;  %v2860_v25 = vld [vmem:[#allocation5 + $0x2b8] sm:$0xff] }
0x210a   :  { %3819 = vmatprep.subr.bf16.mxu0 %v4079_v0 }
0x210d   :  { %3821 = vmatpush3.bf16.msra.mxu0 %v3820_v38  ;;  %v3862_v38 = vpack.c.bf16 %v2867_v36, %v2866_v35 }
0x210e   :  { %3828 = vmatprep.subr.bf16.mxu0 %v4079_v0 }
0x21db   :  { %v2491_v12 = vpop.f32.mrb[26].mxu0 }
0x21dc   :  { %v2492_v11 = vadd.f32 %v3135_v6, %v2491_v12  ;;  %v3571_v13 = vpop.f32.mrb[27].mxu0  ;;  %v3841_v6 = vpack.c.bf16 %v2885_v5, %v2884_v3  ;;  %v2886_v12 = vld [vmem:[#allocation5 + $0x388] sm:$0xff] }
0x21de   :  { %v2495_v14 = vadd.f32 %v2492_v11, %v4398_v19  ;;  %v2887_v11 = vld [vmem:[#allocation5 + $0x390] sm:$0xff] }
0x21df   :  { %v3844_v13 = vpack.c.bf16 %v2887_v11, %v2886_v12 }
0x21e0   :  { %v2496_v15 = vsel %vm185_vm7, %v2495_v14, 0.0 }
0x21e1   :  { %2497 = vadd.xlane.f32.xlu1 %v2496_v15 }
0x226e   :  { %v2498_v18 = vpop.xlane.xlu1 %2497 }
0x226f   :  { %v2499_v20 = vmul.f32 0.0625, %v2498_v18 }
0x2271   :  { %v2500_v48 = vsub.f32 %v2495_v14, %v2499_v20 }
0x2273   :  { %v2501_v21 = vmul.f32 %v2500_v48, %v2500_v48 }
0x2275   :  { %v2502_v22 = vsel %vm185_vm7, %v2501_v21, 0.0 }
0x2276   :  { %2503 = vadd.xlane.f32.xlu1 %v2502_v22  ;;  %v2782_v22 = vld [vmem:[#allocation5 + $0x2a8] sm:$0xff] }
0x2277   :  { %v3826_v7 = vpack.c.bf16 %v2783_v46, %v2782_v22 }
0x2303   :  { %v2504_v19 = vpop.xlane.xlu1 %2503 }
0x2304   :  { %v2505_v26 = vmul.f32 0.0625, %v2504_v19  ;;  %v2861_v19 = vld [vmem:[#allocation5 + $0x2c0] sm:$0xff] }
0x2306   :  { %v2506_v28 = vadd.f32 1e-05, %v2505_v26 }
0x2308   :  { %3975 = vrsqrt.f32 %v2506_v28  ;;  %v3853_v28 = vpack.c.bf16 %v2861_v19, %v2860_v25 }
0x2312   :  { %v3976_v29 = vpop.eup %3975 }
0x2313   :  { %v2508_v31 = vmul.f32 %v3976_v29, %v2500_v48  ;;  %v3143_v48 = vld [vmem:[#allocation5 + $0x3c6] ss:$0 sm:$0xff]  ;;  %v2862_v29 = vld [vmem:[#allocation5 + $0x2c8] sm:$0xff] }
0x2315   :  { %v2513_v33 = vmul.f32 %v3137_v30, %v2508_v31  ;;  %v2863_v30 = vld [vmem:[#allocation5 + $0x2d0] sm:$0xff] }
0x2316   :  { %v3856_v31 = vpack.c.bf16 %v2863_v30, %v2862_v29 }
0x2317   :  { %v2518_v34 = vadd.f32 %v3138_v32, %v2513_v33  ;;  %v2864_v32 = vld [vmem:[#allocation5 + $0x2d8] sm:$0xff]  ;;  %v2865_v33 = vld [vmem:[#allocation5 + $0x2e0] sm:$0xff] }
0x2319   :  { %3577 = vmatmul.mubr.msk.f32.vlgmr.msra.gmra.mrb[24].mxu1 %vm185_vm7, %v2518_v34 }
0x231a   :  { %3594 = vmatprep.mubr.msk.f32.mxu1 %vm4080_vm0, %v4081_v1  ;;  %3824 = vmatpush3.bf16.msra.mxu1 %v3823_v55 }
0x231b   :  { %3825 = vmatprep.subr.bf16.mxu1 %v4079_v0 }
0x23ec   :  { %v2592_v8 = vpop.f32.mrb[24].mxu1 }
0x23ed   :  { %v2593_v9 = vadd.f32 %v3139_v10, %v2592_v8  ;;  %v3578_v39 = vpop.f32.mrb[25].mxu1  ;;  %v2868_v10 = vld [vmem:[#allocation5 + $0x2f8] sm:$0xff]  ;;  %v2869_v8 = vld [vmem:[#allocation5 + $0x300] sm:$0xff] }
0x23ee   :  { %v2871_v39 = vld [vmem:[#allocation5 + $0x310] sm:$0xff] }
0x23ef   :  { %v2596_v40 = vmax.f32 %v2593_v9, 0.0  ;;  %v3865_v9 = vpack.c.bf16 %v2869_v8, %v2868_v10 }
0x23f1   :  { %3588 = vmatmul.mubr.msk.f32.vlgmr.msra.gmra.mrb[28].mxu0 %vm69_vm6, %v2596_v40 }
0x23f2   :  { %3636 = vmatprep.mubr.msk.f32.mxu0 %vm4080_vm0, %v4081_v1  ;;  %3830 = vmatpush3.bf16.msra.mxu0 %v3829_v58  ;;  %v3147_v58 = vld [vmem:[#allocation5 + $0x3c9] ss:$0 sm:$0xff] }
0x23f3   :  { %3831 = vmatprep.subr.bf16.mxu0 %v4079_v0 }
0x23f6   :  { %3833 = vmatpush3.bf16.msra.mxu0 %v3832_v61 }
0x23f7   :  { %3834 = vmatprep.subr.bf16.mxu0 %v4079_v0 }
0x23fa   :  { %3836 = vmatpush3.bf16.msra.mxu0 %v3835_v2 }
0x23fb   :  { %3837 = vmatprep.subr.bf16.mxu0 %v4079_v0 }
0x23fe   :  { %3839 = vmatpush3.bf16.msra.mxu0 %v3838_v4 }
0x23ff   :  { %3840 = vmatprep.subr.bf16.mxu0 %v4079_v0 }
0x2402   :  { %3842 = vmatpush3.bf16.msra.mxu0 %v3841_v6 }
0x2403   :  { %3843 = vmatprep.subr.bf16.mxu0 %v4079_v0 }
0x2406   :  { %3845 = vmatpush3.bf16.msra.mxu0 %v3844_v13 }
0x2407   :  { %3846 = vmatprep.subr.bf16.mxu0 %v4079_v0 }
0x24c4   :  { %v2670_v41 = vpop.f32.mrb[28].mxu0 }
0x24c5   :  { %v2671_v42 = vadd.f32 %v3141_v27, %v2670_v41  ;;  %v3589_v37 = vpop.f32.mrb[29].mxu0  ;;  %v2872_v27 = vld [vmem:[#allocation5 + $0x318] sm:$0xff]  ;;  %v2873_v41 = vld [vmem:[#allocation5 + $0x320] sm:$0xff] }
0x24c6   :  { %v2888_v37 = vld [vmem:[#allocation5 + $0x398] sm:$0xff] }
0x24c7   :  { %v2674_v43 = vadd.f32 %v2671_v42, %v2518_v34  ;;  %v3859_v34 = vpack.c.bf16 %v2865_v33, %v2864_v32  ;;  %v3871_v42 = vpack.c.bf16 %v2873_v41, %v2872_v27 }
0x24c9   :  { %v2675_v44 = vsel %vm185_vm7, %v2674_v43, 0.0 }
0x24ca   :  { %2676 = vadd.xlane.f32.xlu1 %v2675_v44  ;;  %v2874_v44 = vld [vmem:[#allocation5 + $0x328] sm:$0xff] }
0x2557   :  { %v2677_v45 = vpop.xlane.xlu1 %2676 }
0x2558   :  { %v2678_v49 = vmul.f32 0.0625, %v2677_v45 }
0x255a   :  { %v2679_v50 = vsub.f32 %v2674_v43, %v2678_v49  ;;  %v2889_v43 = vld [vmem:[#allocation5 + $0x3a0] sm:$0xff]  ;;  %v2875_v49 = vld [vmem:[#allocation5 + $0x330] sm:$0xff] }
0x255b   :  { %v3847_v45 = vpack.c.bf16 %v2889_v43, %v2888_v37 }
0x255c   :  { %v2680_v51 = vmul.f32 %v2679_v50, %v2679_v50 }
0x255d   :  { %3848 = vmatpush3.bf16.msra.mxu0 %v3847_v45 }
0x255e   :  { %v2681_v52 = vsel %vm185_vm7, %v2680_v51, 0.0  ;;  %3849 = vmatprep.subr.bf16.mxu0 %v4079_v0  ;;  %v2890_v51 = vld [vmem:[#allocation5 + $0x3a8] sm:$0xff] }
0x255f   :  { %2682 = vadd.xlane.f32.xlu0 %v2681_v52  ;;  %v2891_v52 = vld [vmem:[#allocation5 + $0x3b0] sm:$0xff] }
0x2560   :  { %v3850_v53 = vpack.c.bf16 %v2891_v52, %v2890_v51 }
0x2562   :  { %3851 = vmatpush3.bf16.msra.mxu0 %v3850_v53 }
0x25ec   :  { %v2683_v14 = vpop.xlane.xlu0 %2682 }
0x25ed   :  { %v2684_v15 = vmul.f32 0.0625, %v2683_v14 }
0x25ef   :  { %v2685_v18 = vadd.f32 1e-05, %v2684_v15 }
0x25f1   :  { %3977 = vrsqrt.f32 %v2685_v18 }
0x25fb   :  { %v3978_v20 = vpop.eup %3977 }
0x25fc   :  { %v2687_v21 = vmul.f32 %v3978_v20, %v2679_v50  ;;  %v3874_v50 = vpack.c.bf16 %v2875_v49, %v2874_v44 }
0x25fe   :  { %v2692_v23 = vmul.f32 %v3143_v48, %v2687_v21 }
0x2600   :  { %v2697_v24 = vadd.f32 %v3144_v47, %v2692_v23 }
0x2602   :  { %3595 = vmatmul.mubr.msk.f32.vlgmr.msra.gmra.mrb[26].mxu1 %vm185_vm7, %v2697_v24  ;;  %v2698_v26 = vsel %vm185_vm7, %v2697_v24, 0.0 }
0x2603   :  { %3827 = vmatpush3.bf16.msra.mxu1 %v3826_v7  ;;  %3601 = vmatprep.mubr.msk.f32.mxu1 %vm4080_vm0, %v4081_v1  ;;  %2700 = vst [vmem:[#allocation7 + $0x8] sm:$0xff] %v2698_v26 }
0x2604   :  { %3852 = vmatprep.subr.bf16.mxu1 %v4079_v0 }
0x2606   :  { %3602 = vmatmul.mubr.msk.f32.vlgmr.msra.gmra.mrb[28].mxu1 %vm185_vm7, %v2697_v24 }
0x2607   :  { %3854 = vmatpush3.bf16.msra.mxu1 %v3853_v28  ;;  %3671 = vmatprep.mubr.msk.f32.mxu1 %vm4080_vm0, %v4081_v1  ;;  %v2870_v1 = vld [vmem:[#allocation5 + $0x308] sm:$0xff] }
0x2608   :  { %3855 = vmatprep.subr.bf16.mxu1 %v4079_v0  ;;  %v3868_v40 = vpack.c.bf16 %v2871_v39, %v2870_v1 }
0x260b   :  { %3857 = vmatpush3.bf16.msra.mxu1 %v3856_v31 }
0x260c   :  { %3858 = vmatprep.subr.bf16.mxu1 %v4079_v0 }
0x260f   :  { %3860 = vmatpush3.bf16.msra.mxu1 %v3859_v34 }
0x2610   :  { %3861 = vmatprep.subr.bf16.mxu1 %v4079_v0 }
0x2613   :  { %3863 = vmatpush3.bf16.msra.mxu1 %v3862_v38 }
0x2614   :  { %3864 = vmatprep.subr.bf16.mxu1 %v4079_v0 }
0x2617   :  { %3866 = vmatpush3.bf16.msra.mxu1 %v3865_v9 }
0x2618   :  { %3867 = vmatprep.subr.bf16.mxu1 %v4079_v0 }
0x261b   :  { %3869 = vmatpush3.bf16.msra.mxu1 %v3868_v40 }
0x261c   :  { %3870 = vmatprep.subr.bf16.mxu1 %v4079_v0 }
0x261f   :  { %3872 = vmatpush3.bf16.msra.mxu1 %v3871_v42 }
0x2620   :  { %3873 = vmatprep.subr.bf16.mxu1 %v4079_v0 }
0x2623   :  { %3875 = vmatpush3.bf16.msra.mxu1 %v3874_v50 }
0x26d5   :  { %v2777_v55 = vpop.f32.mrb[26].mxu1 }
0x26d6   :  { %v2778_v56 = vadd.f32 %v3145_v54, %v2777_v55  ;;  %v3596_v57 = vpop.f32.mrb[27].mxu1 }
0x26d8   :  { %v2781_v59 = vmax.f32 %v2778_v56, 0.0 }
0x26d9   :  { %v2855_v60 = vpop.f32.mrb[28].mxu1 }
0x26da   :  { %v2856_v61 = vadd.f32 %v3147_v58, %v2855_v60  ;;  %v3603_v62 = vpop.f32.mrb[29].mxu1  ;;  %3672 = vmatmul.mubr.f32.vlgmr.msra.gmra.mrb[30].mxu1 %v2781_v59 }
0x26dc   :  { %v2859_v63 = vmax.f32 %v2856_v61, 0.0 }
0x26de   :  { %3637 = vmatmul.mubr.f32.vlgmr.msra.gmra.mrb[30].mxu0 %v2859_v63 }
0x26df   :  { %4034 = shalt.err (!%p4031_p6)
}
0x26e0   :  { %s4035_s20 = scalar_lea.hbm %s4511_s2, 256 }
0x26e1   :  { %p4036_p7 = scmp.ne.s32.totalorder %s4511_s2, %s4035_s20  ;;  %p4039_p8 = scmp.lt.u32.totalorder %s4035_s20, %s4511_s2 }
0x26e3   :  { %p4041_p9 = pnand %p4039_p8, %p4036_p7 }
0x26e5   :  { %4044 = shalt.err (!%p4041_p9)
}
0x26e6   :  { %3051 = dma.vmem_to_hbm [thread:$0]  %s3046_s16, 256, %s4511_s2, [#allocation4], %s4076_s22, %s4076_s22, %s4077_s23   ;;  %v3149_v16 = vld [vmem:[#allocation5 + $0x3ca] ss:$0 sm:$0xff] }
0x26e7   :  { %s4090_s29 = smov [#allocation8]  }
0x26e8   :  { %s3057_s30 = sshll.u32 %s4090_s29, 4  ;;  %s3058_s30 = int_to_ptr.vmem [resolvable:$true] %s3057_s30 }
0x26e9   :  { %s4045_s4 = scalar_lea.vmem %s3058_s30, 256  ;;  %p4050_p11 = scmp.lt.s32.totalorder %s3058_s30, %s3058_s30 }
0x26ea   :  { %p4046_p10 = scmp.ne.s32.totalorder %s3058_s30, %s4045_s4  ;;  %p4051_p12 = scmp.lt.s32.totalorder %s4045_s4, %s4045_s4 }
0x26ec   :  { %p4052_p13 = por %p4051_p12, %p4050_p11 }
0x26ee   :  { %p4053_p0 = pnand %p4052_p13, %p4046_p10 }
0x27ad   :  { %v3028_v0 = vpop.f32.mrb[30].mxu1 }
0x27ae   :  { %v3673_v2 = vpop.f32.mrb[31].mxu1 }
0x27b1   :  { %v2958_v17 = vpop.f32.mrb[30].mxu0 }
0x27b2   :  { %v3029_v4 = vadd.f32 %v3028_v0, %v2958_v17  ;;  %v3638_v3 = vpop.f32.mrb[31].mxu0 }
0x27b4   :  { %v3037_v5 = vadd.f32 %v3149_v16, %v3029_v4 }
0x27b6   :  { %3039 = vst [vmem:[#allocation8 + $0x8] sm:$0xff] %v3037_v5 }
0x27b7   :  { %4056 = shalt.err (!%p4053_p0)
}
0x27b8   :  { %s4057_s6 = scalar_lea.hbm %s4512_s3, 256 }
0x27b9   :  { %p4058_p1 = scmp.ne.s32.totalorder %s4512_s3, %s4057_s6  ;;  %p4061_p2 = scmp.lt.u32.totalorder %s4057_s6, %s4512_s3 }
0x27bb   :  { %p4063_p3 = pnand %p4061_p2, %p4058_p1 }
0x27bd   :  { %4066 = shalt.err (!%p4063_p3)
}
0x27be   :  { %3063 = dma.vmem_to_hbm [thread:$0]  %s3058_s30, 256, %s4512_s3, [#allocation9], %s4076_s22, %s4076_s22, %s4077_s23  }
0x27bf   :  { %4071 = dma.done.wait [#allocation4], 256  }
0x27c0   :  { %4072 = vsyncadd [#allocation4], 4294967040 }
0x27c1   :  { %4073 = dma.done.wait [#allocation9], 256  }
0x27c2   :  { %4074 = vsyncadd [#allocation9], 4294967040 }
0x27c3   :  { %3070 = vsyncpa [#allocation3], 1 }
0x27c4   :  { %3071 = vsyncpa [#allocation6], 1 }
0x27c5   :  { %3072 = vsyncpa [#allocation4], 1 }
0x27c6   :  { %3073 = vsyncpa [#allocation9], 1 }

</bundles_post_ra>
